<compile_context>
chip_gen: v7x
topology: tpu7x:2x2x1
jax: 0.10.0
libtpu: 0.0.40
codegen_flags: <defaults>
</compile_context>

<pallas_src>
import jax
import jax.numpy as jnp
from jax import lax
from jax.experimental import pallas as pl
from jax.experimental.pallas import tpu as pltpu


def _lstm_kernel(xe_ref, whT_ref, wx_ref, b_ref, phT_ref, pbT_ref,
                 out_ref, xproj_scr):
    """Fused-gate, batch-major LSTM recurrence + output projection + softmax."""
    Tm1, B, _ = xe_ref.shape
    H4 = whT_ref.shape[1]
    H = H4 // 4

    # ---- Precompute x-projections + biases for every timestep (off the serial chain).
    # xe: (T-1, B, 1) f32, wx/b: (1, 1, 4H) f32  ->  (T-1, B, 4H) lane-dense.
    xproj_scr[...] = xe_ref[...] * wx_ref[...] + b_ref[...]

    # ---- Hoist loop-invariant loads / broadcasts out of the recurrence.
    whT = whT_ref[...]                                     # (H, 4H) bf16 fused weight
    lane = lax.broadcasted_iota(jnp.int32, (B, H4), 1)
    is_g = lane < H                                        # first H lanes: g gate (tanh)

    h0 = jnp.zeros((B, H), jnp.float32)
    c0 = jnp.zeros((B, H), jnp.float32)

    def step(t, carry):
        h, c = carry
        # One fused MXU matmul per step: (B, H) @ (H, 4H) -> (B, 4H).
        pre = xproj_scr[t] + jnp.dot(h.astype(whT.dtype), whT,
                                     preferred_element_type=jnp.float32)
        # tanh on the g lanes, sigmoid elsewhere — both evaluated on the full
        # lane-dense (B, 128) tile (2 EUP passes instead of 4 quarter-filled ones).
        act = jnp.where(is_g, jnp.tanh(pre), jax.nn.sigmoid(pre))
        g = act[:, 0 * H:1 * H]
        i = act[:, 1 * H:2 * H]
        f = act[:, 2 * H:3 * H]
        o = act[:, 3 * H:4 * H]
        c_new = g * i + c * f
        h_new = jnp.tanh(c_new) * o
        return h_new, c_new

    # Reference loops over range(seq_length - 1); state stays in registers, unrolled.
    h, _ = lax.fori_loop(0, Tm1, step, (h0, c0), unroll=True)
    # TODO(synk): the reference prints cur_x every step; debug I/O is omitted.

    # p.T = h.T @ ph.T + pb.T  (batch-major). Softmax over the BATCH axis replicates
    # nn.Softmax(dim=1) on p = (C, B) followed by the final .T of the reference.
    p = jnp.dot(h, phT_ref[...], preferred_element_type=jnp.float32) + pbT_ref[...]
    p_max = jnp.max(p, axis=0, keepdims=True)
    e = jnp.exp(p - p_max)
    denom = jnp.sum(e, axis=0, keepdims=True)
    inv = pl.reciprocal(denom, approx=True)                # EUP slot, no VALU divide
    inv = inv * (2.0 - denom * inv)                        # one NR step -> f32 accuracy
    out_ref[...] = e * inv                                 # (B, C)


def _fuse_params(params):
    """One-time wrapper-side fusion of the gate weights into the flipped layout."""
    H = params["gh"].shape[0]
    whT = jnp.concatenate([params["gh"].T, params["ih"].T,
                           params["fh"].T, params["oh"].T], axis=1)      # (H, 4H)
    # bf16 operands for the recurrent matmul (f32 accumulate) — MXU-native on v6e/v7x,
    # fine on v5e; gate/elementwise math stays f32 inside the kernel.
    whT = whT.astype(jnp.bfloat16)
    wx = jnp.concatenate([params["gx"][:, 0], params["ix"][:, 0],
                          params["fx"][:, 0], params["ox"][:, 0]]).reshape(1, 1, 4 * H)
    b = jnp.concatenate([params["gb"][:, 0], params["ib"][:, 0],
                         params["fb"][:, 0], params["ob"][:, 0]]).reshape(1, 1, 4 * H)
    phT = params["ph"].T                                   # (num_classes, hidden)
    pbT = params["pb"].reshape(1, -1)                      # (1, num_classes)
    return whT, wx.astype(jnp.float32), b.astype(jnp.float32), phT, pbT


def lstm_forward(x, params, emb_table):
    """x: (batch, seq_length) int32.  Returns (batch, num_classes) f32."""
    B, T = x.shape
    H = params["gh"].shape[0]
    C = params["ph"].shape[1]
    assert B == H == C, "reference module requires batch == hidden == num_classes"
    assert T >= 2, "reference recurrence runs range(seq_length - 1)"

    whT, wx, b, phT, pbT = _fuse_params(params)

    # Embedding lookup is glue (gather) done in plain JAX.
    xe = jnp.take(emb_table, x, axis=0)                                   # (B, T, 1)
    xe3 = jnp.transpose(xe[:, :T - 1, :], (1, 0, 2)).astype(jnp.float32)  # (T-1, B, 1)

    vmem = pl.BlockSpec(memory_space=pltpu.MemorySpace.VMEM)
    args = (xe3, whT, wx, b, phT, pbT)

    # Single-invocation kernel: everything (< 200 KiB) fits VMEM on v5e/v6e/v7x.
    # TODO(synk): at production sizes, grid over batch with
    #   dimension_semantics=("parallel",) (v7x megacore) and stream xe over T with a
    #   BlockSpec instead of whole-array VMEM residency (budget vs 64 MiB on v7x).
    return pl.pallas_call(
        _lstm_kernel,
        out_shape=jax.ShapeDtypeStruct((B, C), jnp.float32),
        in_specs=[vmem] * len(args),
        out_specs=vmem,
        scratch_shapes=[pltpu.VMEM((T - 1, B, 4 * H), jnp.float32)],  # precomputed x-proj
    )(*args)


def lstm_reference(x, params, emb_table):
    """Pure-JAX mirror of the PyTorch forward (column-per-sample layout)."""
    B, T = x.shape
    H = params["gh"].shape[0]
    h = jnp.zeros((H, B), jnp.float32)
    c = jnp.zeros((H, B), jnp.float32)
    xe = jnp.take(emb_table, x, axis=0)                    # (B, T, 1)
    for t in range(T - 1):
        cur_x = xe[:, t, :]                                # (B, 1)
        g = jnp.tanh(params["gx"] @ cur_x.T + params["gh"] @ h + params["gb"])
        i = jax.nn.sigmoid(params["ix"] @ cur_x.T + params["ih"] @ h + params["ib"])
        f = jax.nn.sigmoid(params["fx"] @ cur_x.T + params["fh"] @ h + params["fb"])
        o = jax.nn.sigmoid(params["ox"] @ cur_x.T + params["oh"] @ h + params["ob"])
        c = g * i + c * f
        h = jnp.tanh(c) * o
    p = params["ph"] @ h + params["pb"]
    y = jax.nn.softmax(p, axis=1)                          # dim=1 == batch axis (quirk kept)
    return y.T


def init_params(key, input_dim, hidden_dim, num_classes):
    """Deterministic init matching torch.normal(0, 1e-4, ...) shapes."""
    std = 1e-4
    keys = jax.random.split(key, 15)

    def n(k, shape):
        return (std * jax.random.normal(k, shape)).astype(jnp.float32)

    params = {
        "gx": n(keys[0], (hidden_dim, input_dim)),
        "gh": n(keys[1], (hidden_dim, hidden_dim)),
        "gb": n(keys[2], (hidden_dim, 1)),
        "ix": n(keys[3], (hidden_dim, input_dim)),
        "ih": n(keys[4], (hidden_dim, hidden_dim)),
        "ib": n(keys[5], (hidden_dim, 1)),
        "fx": n(keys[6], (hidden_dim, input_dim)),
        "fh": n(keys[7], (hidden_dim, hidden_dim)),
        "fb": n(keys[8], (hidden_dim, 1)),
        "ox": n(keys[9], (hidden_dim, input_dim)),
        "oh": n(keys[10], (hidden_dim, hidden_dim)),
        "ob": n(keys[11], (hidden_dim, 1)),
        # ph is created as (num_classes, hidden).T -> (hidden, num_classes)
        "ph": n(keys[12], (num_classes, hidden_dim)).T,
        "pb": n(keys[13], (num_classes, 1)),
    }
    # nn.Embedding(num_classes, 1) default init: N(0, 1)
    emb_table = jax.random.normal(keys[14], (num_classes, 1)).astype(jnp.float32)
    return params, emb_table


if __name__ == "__main__":
    seq_length = 8
    input_dim = 1          # forced by nn.Embedding(num_classes, 1)
    hidden_dim = 32
    num_classes = 32       # must equal hidden_dim for `ph @ h` in the reference
    batch_size = 32        # must equal hidden_dim for the h_prev broadcast

    key = jax.random.PRNGKey(0)
    pkey, xkey = jax.random.split(key)
    params, emb_table = init_params(pkey, input_dim, hidden_dim, num_classes)
    x = jax.random.randint(xkey, (batch_size, seq_length), 0, num_classes,
                           dtype=jnp.int32)

    y = lstm_forward(x, params, emb_table)                 # (batch, num_classes)
    jax.block_until_ready(y)
    assert y.shape == (batch_size, num_classes)

    y_ref = lstm_reference(x, params, emb_table)
    err = float(jnp.max(jnp.abs(y - y_ref)))
    assert bool(jnp.allclose(y, y_ref, rtol=1e-2, atol=1e-4)), f"max abs err {err}"

    print("KERNEL_OK")
</pallas_src>

<mosaic_0001>
module attributes {stable_mosaic.version = 11 : i64} {
  func.func @_lstm_kernel(%arg0: memref<7x32x1xf32, #tpu.memory_space<vmem>>, %arg1: memref<32x128xbf16, #tpu.memory_space<vmem>>, %arg2: memref<1x1x128xf32, #tpu.memory_space<vmem>>, %arg3: memref<1x1x128xf32, #tpu.memory_space<vmem>>, %arg4: memref<32x32xf32, #tpu.memory_space<vmem>>, %arg5: memref<1x32xf32, #tpu.memory_space<vmem>>, %arg6: memref<32x32xf32, #tpu.memory_space<vmem>>, %arg7: memref<7x32x128xf32, #tpu.memory_space<vmem>>) attributes {dimension_semantics = [], scalar_prefetch = 0 : i64, scratch_operands = 1 : i64, tpu.core_type = #tpu.core_type<tc>} {
    %c0 = arith.constant 0 : index
    %c0_0 = arith.constant 0 : index
    %c0_1 = arith.constant 0 : index
    %0 = vector.load %arg0[%c0, %c0_0, %c0_1] : memref<7x32x1xf32, #tpu.memory_space<vmem>>, vector<7x32x1xf32>
    %c0_2 = arith.constant 0 : index
    %c0_3 = arith.constant 0 : index
    %c0_4 = arith.constant 0 : index
    %1 = vector.load %arg2[%c0_2, %c0_3, %c0_4] : memref<1x1x128xf32, #tpu.memory_space<vmem>>, vector<1x1x128xf32>
    %2 = vector.broadcast %0 : vector<7x32x1xf32> to vector<7x32x128xf32>
    %3 = vector.broadcast %1 : vector<1x1x128xf32> to vector<7x32x128xf32>
    %4 = arith.mulf %2, %3 : vector<7x32x128xf32>
    %c0_5 = arith.constant 0 : index
    %c0_6 = arith.constant 0 : index
    %c0_7 = arith.constant 0 : index
    %5 = vector.load %arg3[%c0_5, %c0_6, %c0_7] : memref<1x1x128xf32, #tpu.memory_space<vmem>>, vector<1x1x128xf32>
    %6 = vector.broadcast %5 : vector<1x1x128xf32> to vector<7x32x128xf32>
    %7 = arith.addf %4, %6 : vector<7x32x128xf32>
    %c0_8 = arith.constant 0 : index
    %c0_9 = arith.constant 0 : index
    %c0_10 = arith.constant 0 : index
    %8 = vector.load %arg7[%c0_8, %c0_9, %c0_10] : memref<7x32x128xf32, #tpu.memory_space<vmem>>, vector<7x32x128xf32>
    tpu.vector_store %arg7[%c0_8, %c0_9, %c0_10], %7 {strides = array<i32>} : memref<7x32x128xf32, #tpu.memory_space<vmem>>, vector<7x32x128xf32>,
    %c0_11 = arith.constant 0 : index
    %c0_12 = arith.constant 0 : index
    %9 = vector.load %arg1[%c0_11, %c0_12] : memref<32x128xbf16, #tpu.memory_space<vmem>>, vector<32x128xbf16>
    %10 = tpu.iota {dimensions = array<i32: 1>} : vector<32x128xi32>
    %c32_i32 = arith.constant 32 : i32
    %11 = vector.broadcast %c32_i32 : i32 to vector<32x128xi32>
    %12 = arith.cmpi slt, %10, %11 : vector<32x128xi32>
    %cst = arith.constant 0.000000e+00 : f32
    %13 = vector.broadcast %cst : f32 to vector<32x32xf32>
    %cst_13 = arith.constant 0.000000e+00 : f32
    %14 = vector.broadcast %cst_13 : f32 to vector<32x32xf32>
    %c0_i32 = arith.constant 0 : i32
    %15 = arith.index_cast %c0_i32 : i32 to index
    %c0_14 = arith.constant 0 : index
    %c0_15 = arith.constant 0 : index
    %16 = vector.load %arg7[%15, %c0_14, %c0_15] : memref<7x32x128xf32, #tpu.memory_space<vmem>>, vector<1x32x128xf32>
    %17 = vector.shape_cast %16 : vector<1x32x128xf32> to vector<32x128xf32>
    %18 = arith.truncf %13 : vector<32x32xf32> to vector<32x32xbf16>
    %cst_16 = arith.constant dense<0.000000e+00> : vector<32x128xf32>
    %19 = tpu.matmul %18, %9, %cst_16 {dimension_numbers = #tpu.dot_dimension_numbers<[1], [0], [0], [1], [0, 0, 1, 1], [], []>} : vector<32x32xbf16>, vector<32x128xbf16>, vector<32x128xf32> -> vector<32x128xf32>
    %20 = arith.addf %17, %19 : vector<32x128xf32>
    %21 = math.tanh %20 : vector<32x128xf32>
    %22 = arith.negf %20 : vector<32x128xf32>
    %23 = math.exp %22 : vector<32x128xf32>
    %cst_17 = arith.constant 1.000000e+00 : f32
    %24 = vector.broadcast %cst_17 : f32 to vector<32x128xf32>
    %25 = arith.addf %24, %23 : vector<32x128xf32>
    %26 = arith.divf %24, %25 : vector<32x128xf32>
    %27 = arith.select %12, %21, %26 : vector<32x128xi1>, vector<32x128xf32>
    %28 = vector.extract_strided_slice %27 {offsets = [0, 0], sizes = [32, 32], strides = [1, 1]} : vector<32x128xf32> to vector<32x32xf32>
    %29 = vector.extract_strided_slice %27 {offsets = [0, 32], sizes = [32, 32], strides = [1, 1]} : vector<32x128xf32> to vector<32x32xf32>
    %30 = vector.extract_strided_slice %27 {offsets = [0, 64], sizes = [32, 32], strides = [1, 1]} : vector<32x128xf32> to vector<32x32xf32>
    %31 = vector.extract_strided_slice %27 {offsets = [0, 96], sizes = [32, 32], strides = [1, 1]} : vector<32x128xf32> to vector<32x32xf32>
    %32 = arith.mulf %28, %29 : vector<32x32xf32>
    %33 = arith.mulf %14, %30 : vector<32x32xf32>
    %34 = arith.addf %32, %33 : vector<32x32xf32>
    %35 = math.tanh %34 : vector<32x32xf32>
    %36 = arith.mulf %35, %31 : vector<32x32xf32>
    %c1_i32 = arith.constant 1 : i32
    %37 = arith.index_cast %c1_i32 : i32 to index
    %c0_18 = arith.constant 0 : index
    %c0_19 = arith.constant 0 : index
    %38 = vector.load %arg7[%37, %c0_18, %c0_19] : memref<7x32x128xf32, #tpu.memory_space<vmem>>, vector<1x32x128xf32>
    %39 = vector.shape_cast %38 : vector<1x32x128xf32> to vector<32x128xf32>
    %40 = arith.truncf %36 : vector<32x32xf32> to vector<32x32xbf16>
    %cst_20 = arith.constant dense<0.000000e+00> : vector<32x128xf32>
    %41 = tpu.matmul %40, %9, %cst_20 {dimension_numbers = #tpu.dot_dimension_numbers<[1], [0], [0], [1], [0, 0, 1, 1], [], []>} : vector<32x32xbf16>, vector<32x128xbf16>, vector<32x128xf32> -> vector<32x128xf32>
    %42 = arith.addf %39, %41 : vector<32x128xf32>
    %43 = math.tanh %42 : vector<32x128xf32>
    %44 = arith.negf %42 : vector<32x128xf32>
    %45 = math.exp %44 : vector<32x128xf32>
    %cst_21 = arith.constant 1.000000e+00 : f32
    %46 = vector.broadcast %cst_21 : f32 to vector<32x128xf32>
    %47 = arith.addf %46, %45 : vector<32x128xf32>
    %48 = arith.divf %46, %47 : vector<32x128xf32>
    %49 = arith.select %12, %43, %48 : vector<32x128xi1>, vector<32x128xf32>
    %50 = vector.extract_strided_slice %49 {offsets = [0, 0], sizes = [32, 32], strides = [1, 1]} : vector<32x128xf32> to vector<32x32xf32>
    %51 = vector.extract_strided_slice %49 {offsets = [0, 32], sizes = [32, 32], strides = [1, 1]} : vector<32x128xf32> to vector<32x32xf32>
    %52 = vector.extract_strided_slice %49 {offsets = [0, 64], sizes = [32, 32], strides = [1, 1]} : vector<32x128xf32> to vector<32x32xf32>
    %53 = vector.extract_strided_slice %49 {offsets = [0, 96], sizes = [32, 32], strides = [1, 1]} : vector<32x128xf32> to vector<32x32xf32>
    %54 = arith.mulf %50, %51 : vector<32x32xf32>
    %55 = arith.mulf %34, %52 : vector<32x32xf32>
    %56 = arith.addf %54, %55 : vector<32x32xf32>
    %57 = math.tanh %56 : vector<32x32xf32>
    %58 = arith.mulf %57, %53 : vector<32x32xf32>
    %c2_i32 = arith.constant 2 : i32
    %59 = arith.index_cast %c2_i32 : i32 to index
    %c0_22 = arith.constant 0 : index
    %c0_23 = arith.constant 0 : index
    %60 = vector.load %arg7[%59, %c0_22, %c0_23] : memref<7x32x128xf32, #tpu.memory_space<vmem>>, vector<1x32x128xf32>
    %61 = vector.shape_cast %60 : vector<1x32x128xf32> to vector<32x128xf32>
    %62 = arith.truncf %58 : vector<32x32xf32> to vector<32x32xbf16>
    %cst_24 = arith.constant dense<0.000000e+00> : vector<32x128xf32>
    %63 = tpu.matmul %62, %9, %cst_24 {dimension_numbers = #tpu.dot_dimension_numbers<[1], [0], [0], [1], [0, 0, 1, 1], [], []>} : vector<32x32xbf16>, vector<32x128xbf16>, vector<32x128xf32> -> vector<32x128xf32>
    %64 = arith.addf %61, %63 : vector<32x128xf32>
    %65 = math.tanh %64 : vector<32x128xf32>
    %66 = arith.negf %64 : vector<32x128xf32>
    %67 = math.exp %66 : vector<32x128xf32>
    %cst_25 = arith.constant 1.000000e+00 : f32
    %68 = vector.broadcast %cst_25 : f32 to vector<32x128xf32>
    %69 = arith.addf %68, %67 : vector<32x128xf32>
    %70 = arith.divf %68, %69 : vector<32x128xf32>
    %71 = arith.select %12, %65, %70 : vector<32x128xi1>, vector<32x128xf32>
    %72 = vector.extract_strided_slice %71 {offsets = [0, 0], sizes = [32, 32], strides = [1, 1]} : vector<32x128xf32> to vector<32x32xf32>
    %73 = vector.extract_strided_slice %71 {offsets = [0, 32], sizes = [32, 32], strides = [1, 1]} : vector<32x128xf32> to vector<32x32xf32>
    %74 = vector.extract_strided_slice %71 {offsets = [0, 64], sizes = [32, 32], strides = [1, 1]} : vector<32x128xf32> to vector<32x32xf32>
    %75 = vector.extract_strided_slice %71 {offsets = [0, 96], sizes = [32, 32], strides = [1, 1]} : vector<32x128xf32> to vector<32x32xf32>
    %76 = arith.mulf %72, %73 : vector<32x32xf32>
    %77 = arith.mulf %56, %74 : vector<32x32xf32>
    %78 = arith.addf %76, %77 : vector<32x32xf32>
    %79 = math.tanh %78 : vector<32x32xf32>
    %80 = arith.mulf %79, %75 : vector<32x32xf32>
    %c3_i32 = arith.constant 3 : i32
    %81 = arith.index_cast %c3_i32 : i32 to index
    %c0_26 = arith.constant 0 : index
    %c0_27 = arith.constant 0 : index
    %82 = vector.load %arg7[%81, %c0_26, %c0_27] : memref<7x32x128xf32, #tpu.memory_space<vmem>>, vector<1x32x128xf32>
    %83 = vector.shape_cast %82 : vector<1x32x128xf32> to vector<32x128xf32>
    %84 = arith.truncf %80 : vector<32x32xf32> to vector<32x32xbf16>
    %cst_28 = arith.constant dense<0.000000e+00> : vector<32x128xf32>
    %85 = tpu.matmul %84, %9, %cst_28 {dimension_numbers = #tpu.dot_dimension_numbers<[1], [0], [0], [1], [0, 0, 1, 1], [], []>} : vector<32x32xbf16>, vector<32x128xbf16>, vector<32x128xf32> -> vector<32x128xf32>
    %86 = arith.addf %83, %85 : vector<32x128xf32>
    %87 = math.tanh %86 : vector<32x128xf32>
    %88 = arith.negf %86 : vector<32x128xf32>
    %89 = math.exp %88 : vector<32x128xf32>
    %cst_29 = arith.constant 1.000000e+00 : f32
    %90 = vector.broadcast %cst_29 : f32 to vector<32x128xf32>
    %91 = arith.addf %90, %89 : vector<32x128xf32>
    %92 = arith.divf %90, %91 : vector<32x128xf32>
    %93 = arith.select %12, %87, %92 : vector<32x128xi1>, vector<32x128xf32>
    %94 = vector.extract_strided_slice %93 {offsets = [0, 0], sizes = [32, 32], strides = [1, 1]} : vector<32x128xf32> to vector<32x32xf32>
    %95 = vector.extract_strided_slice %93 {offsets = [0, 32], sizes = [32, 32], strides = [1, 1]} : vector<32x128xf32> to vector<32x32xf32>
    %96 = vector.extract_strided_slice %93 {offsets = [0, 64], sizes = [32, 32], strides = [1, 1]} : vector<32x128xf32> to vector<32x32xf32>
    %97 = vector.extract_strided_slice %93 {offsets = [0, 96], sizes = [32, 32], strides = [1, 1]} : vector<32x128xf32> to vector<32x32xf32>
    %98 = arith.mulf %94, %95 : vector<32x32xf32>
    %99 = arith.mulf %78, %96 : vector<32x32xf32>
    %100 = arith.addf %98, %99 : vector<32x32xf32>
    %101 = math.tanh %100 : vector<32x32xf32>
    %102 = arith.mulf %101, %97 : vector<32x32xf32>
    %c4_i32 = arith.constant 4 : i32
    %103 = arith.index_cast %c4_i32 : i32 to index
    %c0_30 = arith.constant 0 : index
    %c0_31 = arith.constant 0 : index
    %104 = vector.load %arg7[%103, %c0_30, %c0_31] : memref<7x32x128xf32, #tpu.memory_space<vmem>>, vector<1x32x128xf32>
    %105 = vector.shape_cast %104 : vector<1x32x128xf32> to vector<32x128xf32>
    %106 = arith.truncf %102 : vector<32x32xf32> to vector<32x32xbf16>
    %cst_32 = arith.constant dense<0.000000e+00> : vector<32x128xf32>
    %107 = tpu.matmul %106, %9, %cst_32 {dimension_numbers = #tpu.dot_dimension_numbers<[1], [0], [0], [1], [0, 0, 1, 1], [], []>} : vector<32x32xbf16>, vector<32x128xbf16>, vector<32x128xf32> -> vector<32x128xf32>
    %108 = arith.addf %105, %107 : vector<32x128xf32>
    %109 = math.tanh %108 : vector<32x128xf32>
    %110 = arith.negf %108 : vector<32x128xf32>
    %111 = math.exp %110 : vector<32x128xf32>
    %cst_33 = arith.constant 1.000000e+00 : f32
    %112 = vector.broadcast %cst_33 : f32 to vector<32x128xf32>
    %113 = arith.addf %112, %111 : vector<32x128xf32>
    %114 = arith.divf %112, %113 : vector<32x128xf32>
    %115 = arith.select %12, %109, %114 : vector<32x128xi1>, vector<32x128xf32>
    %116 = vector.extract_strided_slice %115 {offsets = [0, 0], sizes = [32, 32], strides = [1, 1]} : vector<32x128xf32> to vector<32x32xf32>
    %117 = vector.extract_strided_slice %115 {offsets = [0, 32], sizes = [32, 32], strides = [1, 1]} : vector<32x128xf32> to vector<32x32xf32>
    %118 = vector.extract_strided_slice %115 {offsets = [0, 64], sizes = [32, 32], strides = [1, 1]} : vector<32x128xf32> to vector<32x32xf32>
    %119 = vector.extract_strided_slice %115 {offsets = [0, 96], sizes = [32, 32], strides = [1, 1]} : vector<32x128xf32> to vector<32x32xf32>
    %120 = arith.mulf %116, %117 : vector<32x32xf32>
    %121 = arith.mulf %100, %118 : vector<32x32xf32>
    %122 = arith.addf %120, %121 : vector<32x32xf32>
    %123 = math.tanh %122 : vector<32x32xf32>
    %124 = arith.mulf %123, %119 : vector<32x32xf32>
    %c5_i32 = arith.constant 5 : i32
    %125 = arith.index_cast %c5_i32 : i32 to index
    %c0_34 = arith.constant 0 : index
    %c0_35 = arith.constant 0 : index
    %126 = vector.load %arg7[%125, %c0_34, %c0_35] : memref<7x32x128xf32, #tpu.memory_space<vmem>>, vector<1x32x128xf32>
    %127 = vector.shape_cast %126 : vector<1x32x128xf32> to vector<32x128xf32>
    %128 = arith.truncf %124 : vector<32x32xf32> to vector<32x32xbf16>
    %cst_36 = arith.constant dense<0.000000e+00> : vector<32x128xf32>
    %129 = tpu.matmul %128, %9, %cst_36 {dimension_numbers = #tpu.dot_dimension_numbers<[1], [0], [0], [1], [0, 0, 1, 1], [], []>} : vector<32x32xbf16>, vector<32x128xbf16>, vector<32x128xf32> -> vector<32x128xf32>
    %130 = arith.addf %127, %129 : vector<32x128xf32>
    %131 = math.tanh %130 : vector<32x128xf32>
    %132 = arith.negf %130 : vector<32x128xf32>
    %133 = math.exp %132 : vector<32x128xf32>
    %cst_37 = arith.constant 1.000000e+00 : f32
    %134 = vector.broadcast %cst_37 : f32 to vector<32x128xf32>
    %135 = arith.addf %134, %133 : vector<32x128xf32>
    %136 = arith.divf %134, %135 : vector<32x128xf32>
    %137 = arith.select %12, %131, %136 : vector<32x128xi1>, vector<32x128xf32>
    %138 = vector.extract_strided_slice %137 {offsets = [0, 0], sizes = [32, 32], strides = [1, 1]} : vector<32x128xf32> to vector<32x32xf32>
    %139 = vector.extract_strided_slice %137 {offsets = [0, 32], sizes = [32, 32], strides = [1, 1]} : vector<32x128xf32> to vector<32x32xf32>
    %140 = vector.extract_strided_slice %137 {offsets = [0, 64], sizes = [32, 32], strides = [1, 1]} : vector<32x128xf32> to vector<32x32xf32>
    %141 = vector.extract_strided_slice %137 {offsets = [0, 96], sizes = [32, 32], strides = [1, 1]} : vector<32x128xf32> to vector<32x32xf32>
    %142 = arith.mulf %138, %139 : vector<32x32xf32>
    %143 = arith.mulf %122, %140 : vector<32x32xf32>
    %144 = arith.addf %142, %143 : vector<32x32xf32>
    %145 = math.tanh %144 : vector<32x32xf32>
    %146 = arith.mulf %145, %141 : vector<32x32xf32>
    %c6_i32 = arith.constant 6 : i32
    %147 = arith.index_cast %c6_i32 : i32 to index
    %c0_38 = arith.constant 0 : index
    %c0_39 = arith.constant 0 : index
    %148 = vector.load %arg7[%147, %c0_38, %c0_39] : memref<7x32x128xf32, #tpu.memory_space<vmem>>, vector<1x32x128xf32>
    %149 = vector.shape_cast %148 : vector<1x32x128xf32> to vector<32x128xf32>
    %150 = arith.truncf %146 : vector<32x32xf32> to vector<32x32xbf16>
    %cst_40 = arith.constant dense<0.000000e+00> : vector<32x128xf32>
    %151 = tpu.matmul %150, %9, %cst_40 {dimension_numbers = #tpu.dot_dimension_numbers<[1], [0], [0], [1], [0, 0, 1, 1], [], []>} : vector<32x32xbf16>, vector<32x128xbf16>, vector<32x128xf32> -> vector<32x128xf32>
    %152 = arith.addf %149, %151 : vector<32x128xf32>
    %153 = math.tanh %152 : vector<32x128xf32>
    %154 = arith.negf %152 : vector<32x128xf32>
    %155 = math.exp %154 : vector<32x128xf32>
    %cst_41 = arith.constant 1.000000e+00 : f32
    %156 = vector.broadcast %cst_41 : f32 to vector<32x128xf32>
    %157 = arith.addf %156, %155 : vector<32x128xf32>
    %158 = arith.divf %156, %157 : vector<32x128xf32>
    %159 = arith.select %12, %153, %158 : vector<32x128xi1>, vector<32x128xf32>
    %160 = vector.extract_strided_slice %159 {offsets = [0, 0], sizes = [32, 32], strides = [1, 1]} : vector<32x128xf32> to vector<32x32xf32>
    %161 = vector.extract_strided_slice %159 {offsets = [0, 32], sizes = [32, 32], strides = [1, 1]} : vector<32x128xf32> to vector<32x32xf32>
    %162 = vector.extract_strided_slice %159 {offsets = [0, 64], sizes = [32, 32], strides = [1, 1]} : vector<32x128xf32> to vector<32x32xf32>
    %163 = vector.extract_strided_slice %159 {offsets = [0, 96], sizes = [32, 32], strides = [1, 1]} : vector<32x128xf32> to vector<32x32xf32>
    %164 = arith.mulf %160, %161 : vector<32x32xf32>
    %165 = arith.mulf %144, %162 : vector<32x32xf32>
    %166 = arith.addf %164, %165 : vector<32x32xf32>
    %167 = math.tanh %166 : vector<32x32xf32>
    %168 = arith.mulf %167, %163 : vector<32x32xf32>
    %c7_i32 = arith.constant 7 : i32
    %c0_42 = arith.constant 0 : index
    %c0_43 = arith.constant 0 : index
    %169 = vector.load %arg4[%c0_42, %c0_43] : memref<32x32xf32, #tpu.memory_space<vmem>>, vector<32x32xf32>
    %cst_44 = arith.constant dense<0.000000e+00> : vector<32x32xf32>
    %170 = tpu.matmul %168, %169, %cst_44 {dimension_numbers = #tpu.dot_dimension_numbers<[1], [0], [0], [1], [0, 0, 1, 1], [], []>} : vector<32x32xf32>, vector<32x32xf32>, vector<32x32xf32> -> vector<32x32xf32>
    %c0_45 = arith.constant 0 : index
    %c0_46 = arith.constant 0 : index
    %171 = vector.load %arg5[%c0_45, %c0_46] : memref<1x32xf32, #tpu.memory_space<vmem>>, vector<1x32xf32>
    %172 = vector.broadcast %171 : vector<1x32xf32> to vector<32x32xf32>
    %173 = arith.addf %170, %172 : vector<32x32xf32>
    %cst_47 = arith.constant dense<0xFF800000> : vector<32xf32>
    %174 = vector.multi_reduction <maximumf>, %173, %cst_47 [0] : vector<32x32xf32> to vector<32xf32>
    %175 = vector.shape_cast %174 : vector<32xf32> to vector<1x32xf32>
    %176 = vector.broadcast %175 : vector<1x32xf32> to vector<32x32xf32>
    %177 = arith.subf %173, %176 : vector<32x32xf32>
    %178 = math.exp %177 : vector<32x32xf32>
    %cst_48 = arith.constant dense<0.000000e+00> : vector<32xf32>
    %179 = vector.multi_reduction <add>, %178, %cst_48 [0] : vector<32x32xf32> to vector<32xf32>
    %180 = vector.shape_cast %179 : vector<32xf32> to vector<1x32xf32>
    %181 = tpu.reciprocal %180 {approx = true} : vector<1x32xf32> -> vector<1x32xf32>
    %182 = arith.mulf %180, %181 : vector<1x32xf32>
    %cst_49 = arith.constant 2.000000e+00 : f32
    %183 = vector.broadcast %cst_49 : f32 to vector<1x32xf32>
    %184 = arith.subf %183, %182 : vector<1x32xf32>
    %185 = arith.mulf %181, %184 : vector<1x32xf32>
    %186 = vector.broadcast %185 : vector<1x32xf32> to vector<32x32xf32>
    %187 = arith.mulf %178, %186 : vector<32x32xf32>
    %c0_50 = arith.constant 0 : index
    %c0_51 = arith.constant 0 : index
    %188 = vector.load %arg6[%c0_50, %c0_51] : memref<32x32xf32, #tpu.memory_space<vmem>>, vector<32x32xf32>
    tpu.vector_store %arg6[%c0_50, %c0_51], %187 {strides = array<i32>} : memref<32x32xf32, #tpu.memory_space<vmem>>, vector<32x32xf32>,
    return
  }
}

</mosaic_0001>

<bundles_post_ra>
// kernel: tpu_custom_call.1
= control target key start
LH: loop header
LB: loop body
LE: loop exit
PB: predicated region body
PF: predicated region fallthrough
CT: control target
= control target key end

     0   :  { %v2025_v2 = vmov 0   ;;  %s2562_s0 = inlined_call_operand.vmem [shape: f32[7,32,1], index: 0, kind: input, shape index: {}]   ;;  %s2563_s1 = inlined_call_operand.vmem [shape: bf16[32,128], index: 1, kind: input, shape index: {}]   ;;  %s2564_s2 = inlined_call_operand.vmem [shape: f32[1,1,128], index: 2, kind: input, shape index: {}]   ;;  %s2565_s3 = inlined_call_operand.vmem [shape: f32[1,1,128], index: 3, kind: input, shape index: {}]   ;;  %s2566_s4 = inlined_call_operand.vmem [shape: f32[32,32], index: 4, kind: input, shape index: {}]   ;;  %s2567_s5 = inlined_call_operand.vmem [shape: f32[1,32], index: 5, kind: input, shape index: {}]   ;;  %s2568_s6 = inlined_call_operand.hbm [shape: f32[32,32], index: 6, kind: output, shape index: {}]  }
   0x1   :  { %v2070_v0 = vld [vmem:[%s2563_s1] sm:$0xff]   ;;  %v2075_v1 = vld [vmem:[%s2563_s1 + $0x8] sm:$0xff]   ;;  %1678 = vmatprep.mubr.bf16.mxu0 %v2025_v2  ;;  %1760 = vset.pattern.permute.xlu1 %v2025_v2  ;;  %v27_v3 = vld [vmem:[%s2562_s0 + $0x10] sm:$0xff] }
   0x2   :  { %1674 = vmatprep.subr.bf16.mxu0 %v2070_v0  ;;  %1759 = vset.pattern.permute.xlu0 %v2025_v2  ;;  %v25_v4 = vld [vmem:[%s2562_s0] sm:$0xff] }
   0x3   :  { %1675 = vmatpush3.bf16.msra.mxu0 %v2070_v0  ;;  %66 = vperm.xlu1 %1760, %v27_v3  }
   0x4   :  { %11 = vsyncpa [#allocation4], 0  ;;  %1676 = vmatprep.subr.bf16.mxu0 %v2075_v1  ;;  %v28_v5 = vld [vmem:[%s2562_s0 + $0x18] sm:$0xff]  ;;  %56 = vperm.xlu0 %1759, %v25_v4   ;;  %v26_v6 = vld [vmem:[%s2562_s0 + $0x8] sm:$0xff]  ;;  %v295_v38 = vlaneseq  ;;  %s2026_s13 = smov 96   ;;  %s2027_s14 = smov 64  }
   0x5   :  { %1682 = vmatprep.subr.bf16.mxu1 %v2070_v0  ;;  %v2106_v9 = vld [vmem:[%s2564_s2] ss:$0 sm:$0xff]  ;;  %s2028_s15 = smov 32   ;;  %v30_v60 = vld [vmem:[%s2562_s0 + $0x28] sm:$0xff]  ;;  %v31_v61 = vld [vmem:[%s2562_s0 + $0x30] sm:$0xff]  ;;  %vm314_vm1 = vcmask 261120  }
   0x6   :  { %1683 = vmatpush3.bf16.msra.mxu1 %v2070_v0  ;;  %v2114_v15 = vld [vmem:[%s2565_s3] ss:$0 sm:$0xff]  ;;  %v2121_v42 = vand.u32 127, %v295_v38  ;;  %v32_v62 = vld [vmem:[%s2562_s0 + $0x38] sm:$0xff] }
   0x7   :  { %1677 = vmatpush3.bf16.msra.mxu0 %v2075_v1  ;;  %71 = vperm.xlu1 %1760, %v28_v5   ;;  %v29_v59 = vld [vmem:[%s2562_s0 + $0x20] sm:$0xff] }
   0x8   :  { %61 = vperm.xlu0 %1759, %v26_v6   ;;  %1684 = vmatprep.subr.bf16.mxu1 %v2075_v1  ;;  %vm297_vm0 = vcmp.lt.s32.totalorder %v2121_v42, 32 }
   0x9   :  { %1690 = vmatprep.subr.bf16.mxu0 %v2070_v0 }
   0xa   :  { %1679 = vmatmul.mubr.bf16.vlgmr.msra.gmra.mrb[0].mxu0 %v2025_v2  ;;  %1685 = vmatpush3.bf16.msra.mxu1 %v2075_v1 }
   0xb   :  { %1691 = vmatpush3.bf16.msra.mxu0 %v2070_v0  ;;  %1698 = vmatprep.subr.bf16.mxu1 %v2070_v0 }
   0xc   :  { %1692 = vmatprep.subr.bf16.mxu0 %v2075_v1 }
   0xf   :  { %1693 = vmatpush3.bf16.msra.mxu0 %v2075_v1 }
  0x10   :  { %1706 = vmatprep.subr.bf16.mxu0 %v2070_v0 }
  0x82   :  { %v67_v8 = vpop.permute.xlu1 %66 }
  0x83   :  { %v57_v7 = vpop.permute.xlu0 %56  ;;  %v202_v13 = vmul.f32 %v2106_v9, %v67_v8 }
  0x84   :  { %v200_v12 = vmul.f32 %v2106_v9, %v57_v7 }
  0x85   :  { %v237_v18 = vadd.f32 %v2114_v15, %v202_v13 }
  0x86   :  { %v72_v11 = vpop.permute.xlu1 %71  ;;  %v235_v17 = vadd.f32 %v2114_v15, %v200_v12 }
  0x87   :  { %v62_v10 = vpop.permute.xlu0 %61  ;;  %v203_v16 = vmul.f32 %v2106_v9, %v72_v11 }
  0x88   :  { %v201_v14 = vmul.f32 %v2106_v9, %v62_v10 }
  0x89   :  { %v238_v23 = vadd.f32 %v2114_v15, %v203_v16 }
  0x8a   :  { %v236_v20 = vadd.f32 %v2114_v15, %v201_v14 }
  0xdd   :  { %v1680_v19 = vpop.f32.mrb[0].mxu0 }
  0xde   :  { %v369_v21 = vadd.f32 %v1680_v19, %v237_v18  ;;  %v352_v22 = vpop.f32.mrb[1].mxu0 }
  0xdf   :  { %v367_v24 = vadd.f32 %v352_v22, %v235_v17  ;;  %v1681_v25 = vpop.f32.mrb[2].mxu0 }
  0xe0   :  { %v1595_v26 = vmul.f32 -1.442695, %v369_v21  ;;  %v370_v27 = vadd.f32 %v1681_v25, %v238_v23  ;;  %v355_v28 = vpop.f32.mrb[3].mxu0 }
  0xe1   :  { %v1593_v29 = vmul.f32 -1.442695, %v367_v24  ;;  %v368_v30 = vadd.f32 %v355_v28, %v236_v20 }
  0xe2   :  { %1763 = vpow2.f32 %v1595_v26  ;;  %v1596_v31 = vmul.f32 -1.442695, %v370_v27 }
  0xe3   :  { %1765 = vpow2.f32 %v1593_v29  ;;  %v1594_v32 = vmul.f32 -1.442695, %v368_v30 }
  0xe4   :  { %1767 = vpow2.f32 %v1596_v31 }
  0xe5   :  { %1769 = vpow2.f32 %v1594_v32 }
  0xe6   :  { %1771 = vtanh.f32 %v369_v21 }
  0xec   :  { %v1764_v33 = vpop.eup %1763 }
  0xed   :  { %v1766_v34 = vpop.eup %1765  ;;  %v389_v35 = vadd.f32 1.0, %v1764_v33 }
  0xee   :  { %v387_v36 = vadd.f32 1.0, %v1766_v34  ;;  %v1768_v37 = vpop.eup %1767 }
  0xef   :  { %1773 = vrcp.f32 %v389_v35  ;;  %v390_v39 = vadd.f32 1.0, %v1768_v37  ;;  %v1770_v40 = vpop.eup %1769 }
  0xf0   :  { %1775 = vtanh.f32 %v370_v27  ;;  %v388_v41 = vadd.f32 1.0, %v1770_v40  ;;  %v1772_v43 = vpop.eup %1771 }
  0xf1   :  { %1777 = vrcp.f32 %v387_v36 }
  0xf2   :  { %1779 = vrcp.f32 %v390_v39 }
  0xf3   :  { %1781 = vtanh.f32 %v367_v24 }
  0xf4   :  { %1783 = vrcp.f32 %v388_v41 }
  0xf5   :  { %1785 = vtanh.f32 %v368_v30 }
  0xf9   :  { %v1774_v44 = vpop.eup %1773 }
  0xfa   :  { %v1776_v45 = vpop.eup %1775  ;;  %v401_v46 = vsel %vm297_vm0, %v1772_v43, %v1774_v44 }
  0xfb   :  { %v1778_v47 = vpop.eup %1777  ;;  %411 = vrot.lane.b32.xlu0 %v401_v46, %s2026_s13  ;;  %v425_v57 = vmul.f32 0.0, %v401_v46 }
  0xfc   :  { %v1780_v48 = vpop.eup %1779 }
  0xfd   :  { %v1782_v49 = vpop.eup %1781  ;;  %v402_v50 = vsel %vm297_vm0, %v1776_v45, %v1780_v48 }
  0xfe   :  { %v1784_v51 = vpop.eup %1783  ;;  %413 = vrot.lane.b32.xlu1 %v402_v50, %s2026_s13  ;;  %v399_v52 = vsel %vm297_vm0, %v1782_v49, %v1778_v47  ;;  %v426_v58 = vmul.f32 0.0, %v402_v50 }
  0xff   :  { %407 = vrot.lane.b32.xlu0 %v399_v52, %s2026_s13  ;;  %v1786_v53 = vpop.eup %1785  ;;  %v423_v55 = vmul.f32 0.0, %v399_v52 }
 0x100   :  { %v400_v54 = vsel %vm297_vm0, %v1786_v53, %v1784_v51 }
 0x101   :  { %v424_v56 = vmul.f32 0.0, %v400_v54 }
 0x102   :  { %409 = vrot.lane.b32.xlu1 %v400_v54, %s2026_s13 }
 0x103   :  { %431 = vrot.lane.b32.xlu0 %v423_v55, %s2027_s14 }
 0x106   :  { %433 = vrot.lane.b32.xlu1 %v424_v56, %s2027_s14 }
 0x107   :  { %435 = vrot.lane.b32.xlu0 %v425_v57, %s2027_s14 }
 0x10a   :  { %437 = vrot.lane.b32.xlu1 %v426_v58, %s2027_s14 }
 0x10b   :  { %451 = vrot.lane.b32.xlu0 %v399_v52, %s2028_s15 }
 0x10e   :  { %453 = vrot.lane.b32.xlu1 %v400_v54, %s2028_s15 }
 0x10f   :  { %455 = vrot.lane.b32.xlu0 %v401_v46, %s2028_s15 }
 0x112   :  { %457 = vrot.lane.b32.xlu1 %v402_v50, %s2028_s15 }
 0x113   :  { %76 = vperm.xlu0 %1759, %v29_v59  }
 0x116   :  { %81 = vperm.xlu1 %1760, %v30_v60  }
 0x117   :  { %86 = vperm.xlu0 %1759, %v31_v61  }
 0x11a   :  { %91 = vperm.xlu1 %1760, %v32_v62  }
 0x16d   :  { %v412_v63 = vpop.permute.xlu0 %411 }
 0x16e   :  { %v421_v10 = vmul.f32 %v412_v63, %v401_v46 }
 0x170   :  { %v414_v2 = vpop.permute.xlu1 %413 }
 0x171   :  { %v408_v3 = vpop.permute.xlu0 %407  ;;  %v422_v16 = vmul.f32 %v414_v2, %v402_v50 }
 0x172   :  { %v419_v4 = vmul.f32 %v408_v3, %v399_v52 }
 0x174   :  { %v410_v5 = vpop.permute.xlu1 %409 }
 0x175   :  { %v432_v6 = vpop.permute.xlu0 %431  ;;  %v420_v8 = vmul.f32 %v410_v5, %v400_v54 }
 0x176   :  { %v2156_v7 = vadd.f32 %v432_v6, %v419_v4 }
 0x178   :  { %v434_v11 = vpop.permute.xlu1 %433  ;;  %1787 = vtanh.f32 %v2156_v7 }
 0x179   :  { %v2159_v12 = vadd.f32 %v434_v11, %v420_v8  ;;  %v436_v13 = vpop.permute.xlu0 %435 }
 0x17a   :  { %v2161_v14 = vadd.f32 %v436_v13, %v421_v10 }
 0x17b   :  { %1789 = vtanh.f32 %v2159_v12 }
 0x17c   :  { %v438_v17 = vpop.permute.xlu1 %437  ;;  %1791 = vtanh.f32 %v2161_v14 }
 0x17d   :  { %v2165_v18 = vadd.f32 %v438_v17, %v422_v16  ;;  %v452_v20 = vpop.permute.xlu0 %451 }
 0x17f   :  { %1793 = vtanh.f32 %v2165_v18 }
 0x180   :  { %v454_v21 = vpop.permute.xlu1 %453 }
 0x181   :  { %v456_v28 = vpop.permute.xlu0 %455 }
 0x182   :  { %v1788_v19 = vpop.eup %1787 }
 0x183   :  { %v463_v23 = vmul.f32 %v1788_v19, %v452_v20 }
 0x184   :  { %v458_v29 = vpop.permute.xlu1 %457 }
 0x185   :  { %v1790_v22 = vpop.eup %1789 }
 0x186   :  { %v464_v24 = vmul.f32 %v1790_v22, %v454_v21  ;;  %v1792_v25 = vpop.eup %1791  ;;  %v33_v22 = vld [vmem:[%s2562_s0 + $0x40] sm:$0xff] }
 0x187   :  { %v465_v30 = vmul.f32 %v1792_v25, %v456_v28  ;;  %v36_v25 = vld [vmem:[%s2562_s0 + $0x58] sm:$0xff] }
 0x188   :  { %v472_v26 = vpack.c.bf16 %v464_v24, %v463_v23  ;;  %v34_v23 = vld [vmem:[%s2562_s0 + $0x48] sm:$0xff]  ;;  %v35_v24 = vld [vmem:[%s2562_s0 + $0x50] sm:$0xff] }
 0x189   :  { %v1794_v27 = vpop.eup %1793 }
 0x18a   :  { %v466_v31 = vmul.f32 %v1794_v27, %v458_v29  ;;  %1686 = vmatprep.mubr.msk.bf16.mxu1 %vm314_vm1, %v472_v26 }
 0x18c   :  { %v473_v32 = vpack.c.bf16 %v466_v31, %v465_v30 }
 0x18e   :  { %1687 = vmatmul.mubr.msk.bf16.vlgmr.msra.gmra.mrb[0].mxu1 %vm314_vm1, %v473_v32 }
 0x18f   :  { %1699 = vmatpush3.bf16.msra.mxu1 %v2070_v0 }
 0x190   :  { %1700 = vmatprep.subr.bf16.mxu1 %v2075_v1 }
 0x192   :  { %v77_v33 = vpop.permute.xlu0 %76 }
 0x193   :  { %1701 = vmatpush3.bf16.msra.mxu1 %v2075_v1  ;;  %v204_v38 = vmul.f32 %v2106_v9, %v77_v33 }
 0x194   :  { %1714 = vmatprep.subr.bf16.mxu1 %v2070_v0 }
 0x195   :  { %v82_v34 = vpop.permute.xlu1 %81  ;;  %v239_v44 = vadd.f32 %v2114_v15, %v204_v38 }
 0x196   :  { %v87_v35 = vpop.permute.xlu0 %86  ;;  %v205_v40 = vmul.f32 %v2106_v9, %v82_v34 }
 0x197   :  { %v206_v37 = vmul.f32 %v2106_v9, %v87_v35 }
 0x198   :  { %v240_v50 = vadd.f32 %v2114_v15, %v205_v40 }
 0x199   :  { %v92_v36 = vpop.permute.xlu1 %91  ;;  %v241_v41 = vadd.f32 %v2114_v15, %v206_v37 }
 0x19a   :  { %v207_v39 = vmul.f32 %v2106_v9, %v92_v36 }
 0x19c   :  { %v242_v47 = vadd.f32 %v2114_v15, %v207_v39 }
 0x261   :  { %v1688_v43 = vpop.f32.mrb[0].mxu1 }
 0x262   :  { %v531_v45 = vadd.f32 %v1688_v43, %v241_v41  ;;  %v514_v46 = vpop.f32.mrb[1].mxu1 }
 0x263   :  { %v529_v48 = vadd.f32 %v514_v46, %v239_v44  ;;  %v1689_v49 = vpop.f32.mrb[2].mxu1 }
 0x264   :  { %v1601_v51 = vmul.f32 -1.442695, %v531_v45  ;;  %v532_v52 = vadd.f32 %v1689_v49, %v242_v47  ;;  %v517_v53 = vpop.f32.mrb[3].mxu1 }
 0x265   :  { %v1599_v54 = vmul.f32 -1.442695, %v529_v48  ;;  %v530_v55 = vadd.f32 %v517_v53, %v240_v50 }
 0x266   :  { %1795 = vpow2.f32 %v1601_v51  ;;  %v1602_v56 = vmul.f32 -1.442695, %v532_v52 }
 0x267   :  { %1797 = vpow2.f32 %v1599_v54  ;;  %v1600_v57 = vmul.f32 -1.442695, %v530_v55 }
 0x268   :  { %1799 = vpow2.f32 %v1602_v56 }
 0x269   :  { %1801 = vpow2.f32 %v1600_v57 }
 0x26a   :  { %1803 = vtanh.f32 %v531_v45 }
 0x270   :  { %v1796_v58 = vpop.eup %1795 }
 0x271   :  { %v1798_v59 = vpop.eup %1797  ;;  %v551_v60 = vadd.f32 1.0, %v1796_v58 }
 0x272   :  { %v549_v61 = vadd.f32 1.0, %v1798_v59  ;;  %v1800_v62 = vpop.eup %1799 }
 0x273   :  { %1805 = vrcp.f32 %v551_v60  ;;  %v552_v63 = vadd.f32 1.0, %v1800_v62  ;;  %v1802_v2 = vpop.eup %1801 }
 0x274   :  { %1807 = vtanh.f32 %v532_v52  ;;  %v550_v3 = vadd.f32 1.0, %v1802_v2  ;;  %v1804_v4 = vpop.eup %1803 }
 0x275   :  { %1809 = vrcp.f32 %v549_v61 }
 0x276   :  { %1811 = vrcp.f32 %v552_v63 }
 0x277   :  { %1813 = vtanh.f32 %v529_v48 }
 0x278   :  { %1815 = vrcp.f32 %v550_v3 }
 0x279   :  { %1817 = vtanh.f32 %v530_v55 }
 0x27d   :  { %v1806_v5 = vpop.eup %1805 }
 0x27e   :  { %v1808_v6 = vpop.eup %1807  ;;  %v563_v8 = vsel %vm297_vm0, %v1804_v4, %v1806_v5 }
 0x27f   :  { %v1810_v10 = vpop.eup %1809  ;;  %573 = vrot.lane.b32.xlu0 %v563_v8, %s2026_s13 }
 0x280   :  { %v1812_v11 = vpop.eup %1811 }
 0x281   :  { %v1814_v13 = vpop.eup %1813  ;;  %v564_v16 = vsel %vm297_vm0, %v1808_v6, %v1812_v11 }
 0x282   :  { %v1816_v17 = vpop.eup %1815  ;;  %575 = vrot.lane.b32.xlu1 %v564_v16, %s2026_s13  ;;  %v561_v19 = vsel %vm297_vm0, %v1814_v13, %v1810_v10 }
 0x283   :  { %569 = vrot.lane.b32.xlu0 %v561_v19, %s2026_s13  ;;  %v1818_v20 = vpop.eup %1817 }
 0x284   :  { %v562_v21 = vsel %vm297_vm0, %v1818_v20, %v1816_v17 }
 0x286   :  { %571 = vrot.lane.b32.xlu1 %v562_v21, %s2026_s13 }
 0x287   :  { %585 = vrot.lane.b32.xlu0 %v561_v19, %s2027_s14 }
 0x28a   :  { %587 = vrot.lane.b32.xlu1 %v562_v21, %s2027_s14 }
 0x28b   :  { %589 = vrot.lane.b32.xlu0 %v563_v8, %s2027_s14 }
 0x28e   :  { %591 = vrot.lane.b32.xlu1 %v564_v16, %s2027_s14 }
 0x28f   :  { %609 = vrot.lane.b32.xlu0 %v561_v19, %s2028_s15 }
 0x292   :  { %611 = vrot.lane.b32.xlu1 %v562_v21, %s2028_s15 }
 0x293   :  { %613 = vrot.lane.b32.xlu0 %v563_v8, %s2028_s15 }
 0x296   :  { %615 = vrot.lane.b32.xlu1 %v564_v16, %s2028_s15 }
 0x297   :  { %96 = vperm.xlu0 %1759, %v33_v22  }
 0x29a   :  { %101 = vperm.xlu1 %1760, %v34_v23  }
 0x29b   :  { %106 = vperm.xlu0 %1759, %v35_v24  }
 0x29e   :  { %111 = vperm.xlu1 %1760, %v36_v25  }
 0x2f1   :  { %v574_v26 = vpop.permute.xlu0 %573 }
 0x2f2   :  { %v583_v38 = vmul.f32 %v574_v26, %v563_v8 }
 0x2f4   :  { %v576_v27 = vpop.permute.xlu1 %575 }
 0x2f5   :  { %v570_v28 = vpop.permute.xlu0 %569  ;;  %v584_v44 = vmul.f32 %v576_v27, %v564_v16 }
 0x2f6   :  { %v581_v31 = vmul.f32 %v570_v28, %v561_v19 }
 0x2f8   :  { %v572_v29 = vpop.permute.xlu1 %571 }
 0x2f9   :  { %v586_v30 = vpop.permute.xlu0 %585  ;;  %v582_v35 = vmul.f32 %v572_v29, %v562_v21 }
 0x2fa   :  { %v597_v32 = vmul.f32 %v586_v30, %v2156_v7 }
 0x2fc   :  { %v2215_v33 = vadd.f32 %v597_v32, %v581_v31  ;;  %v588_v34 = vpop.permute.xlu1 %587 }
 0x2fd   :  { %v598_v36 = vmul.f32 %v588_v34, %v2159_v12  ;;  %v590_v37 = vpop.permute.xlu0 %589 }
 0x2fe   :  { %v599_v39 = vmul.f32 %v590_v37, %v2161_v14  ;;  %1819 = vtanh.f32 %v2215_v33 }
 0x2ff   :  { %v2220_v40 = vadd.f32 %v598_v36, %v582_v35 }
 0x300   :  { %v2222_v41 = vadd.f32 %v599_v39, %v583_v38  ;;  %v592_v43 = vpop.permute.xlu1 %591 }
 0x301   :  { %1821 = vtanh.f32 %v2220_v40  ;;  %v600_v7 = vmul.f32 %v592_v43, %v2165_v18  ;;  %v610_v14 = vpop.permute.xlu0 %609 }
 0x302   :  { %1823 = vtanh.f32 %v2222_v41 }
 0x303   :  { %v2227_v45 = vadd.f32 %v600_v7, %v584_v44 }
 0x304   :  { %v612_v46 = vpop.permute.xlu1 %611 }
 0x305   :  { %1825 = vtanh.f32 %v2227_v45  ;;  %v614_v53 = vpop.permute.xlu0 %613 }
 0x308   :  { %v1820_v12 = vpop.eup %1819  ;;  %v616_v54 = vpop.permute.xlu1 %615 }
 0x309   :  { %v621_v48 = vmul.f32 %v1820_v12, %v610_v14 }
 0x30b   :  { %v1822_v47 = vpop.eup %1821 }
 0x30c   :  { %v622_v49 = vmul.f32 %v1822_v47, %v612_v46  ;;  %v1824_v50 = vpop.eup %1823  ;;  %v37_v47 = vld [vmem:[%s2562_s0 + $0x60] sm:$0xff] }
 0x30d   :  { %v623_v55 = vmul.f32 %v1824_v50, %v614_v53  ;;  %v40_v50 = vld [vmem:[%s2562_s0 + $0x78] sm:$0xff] }
 0x30e   :  { %v630_v51 = vpack.c.bf16 %v622_v49, %v621_v48  ;;  %v38_v48 = vld [vmem:[%s2562_s0 + $0x68] sm:$0xff]  ;;  %v39_v49 = vld [vmem:[%s2562_s0 + $0x70] sm:$0xff] }
 0x30f   :  { %v1826_v52 = vpop.eup %1825 }
 0x310   :  { %v624_v56 = vmul.f32 %v1826_v52, %v616_v54  ;;  %1694 = vmatprep.mubr.msk.bf16.mxu0 %vm314_vm1, %v630_v51 }
 0x312   :  { %v631_v18 = vpack.c.bf16 %v624_v56, %v623_v55 }
 0x314   :  { %1695 = vmatmul.mubr.msk.bf16.vlgmr.msra.gmra.mrb[4].mxu0 %vm314_vm1, %v631_v18 }
 0x315   :  { %1707 = vmatpush3.bf16.msra.mxu0 %v2070_v0 }
 0x316   :  { %1708 = vmatprep.subr.bf16.mxu0 %v2075_v1  ;;  %v97_v57 = vpop.permute.xlu0 %96 }
 0x317   :  { %v208_v62 = vmul.f32 %v2106_v9, %v97_v57 }
 0x319   :  { %1709 = vmatpush3.bf16.msra.mxu0 %v2075_v1  ;;  %v102_v58 = vpop.permute.xlu1 %101  ;;  %v243_v5 = vadd.f32 %v2114_v15, %v208_v62 }
 0x31a   :  { %1722 = vmatprep.subr.bf16.mxu0 %v2070_v0  ;;  %v107_v59 = vpop.permute.xlu0 %106  ;;  %v209_v2 = vmul.f32 %v2106_v9, %v102_v58 }
 0x31b   :  { %v210_v61 = vmul.f32 %v2106_v9, %v107_v59 }
 0x31c   :  { %v244_v16 = vadd.f32 %v2114_v15, %v209_v2 }
 0x31d   :  { %v112_v60 = vpop.permute.xlu1 %111  ;;  %v245_v3 = vadd.f32 %v2114_v15, %v210_v61 }
 0x31e   :  { %v211_v63 = vmul.f32 %v2106_v9, %v112_v60 }
 0x320   :  { %v246_v10 = vadd.f32 %v2114_v15, %v211_v63 }
 0x3e7   :  { %v1696_v4 = vpop.f32.mrb[4].mxu0 }
 0x3e8   :  { %v689_v6 = vadd.f32 %v1696_v4, %v245_v3  ;;  %v672_v8 = vpop.f32.mrb[5].mxu0 }
 0x3e9   :  { %v687_v11 = vadd.f32 %v672_v8, %v243_v5  ;;  %v1697_v13 = vpop.f32.mrb[6].mxu0 }
 0x3ea   :  { %v1607_v17 = vmul.f32 -1.442695, %v689_v6  ;;  %v690_v19 = vadd.f32 %v1697_v13, %v246_v10  ;;  %v675_v20 = vpop.f32.mrb[7].mxu0 }
 0x3eb   :  { %v1605_v21 = vmul.f32 -1.442695, %v687_v11  ;;  %v688_v22 = vadd.f32 %v675_v20, %v244_v16 }
 0x3ec   :  { %1827 = vpow2.f32 %v1607_v17  ;;  %v1608_v23 = vmul.f32 -1.442695, %v690_v19 }
 0x3ed   :  { %1829 = vpow2.f32 %v1605_v21  ;;  %v1606_v24 = vmul.f32 -1.442695, %v688_v22 }
 0x3ee   :  { %1831 = vpow2.f32 %v1608_v23 }
 0x3ef   :  { %1833 = vpow2.f32 %v1606_v24 }
 0x3f0   :  { %1835 = vtanh.f32 %v689_v6 }
 0x3f6   :  { %v1828_v25 = vpop.eup %1827 }
 0x3f7   :  { %v1830_v26 = vpop.eup %1829  ;;  %v709_v27 = vadd.f32 1.0, %v1828_v25 }
 0x3f8   :  { %v707_v28 = vadd.f32 1.0, %v1830_v26  ;;  %v1832_v29 = vpop.eup %1831 }
 0x3f9   :  { %1837 = vrcp.f32 %v709_v27  ;;  %v710_v30 = vadd.f32 1.0, %v1832_v29  ;;  %v1834_v31 = vpop.eup %1833 }
 0x3fa   :  { %1839 = vtanh.f32 %v690_v19  ;;  %v708_v32 = vadd.f32 1.0, %v1834_v31  ;;  %v1836_v34 = vpop.eup %1835 }
 0x3fb   :  { %1841 = vrcp.f32 %v707_v28 }
 0x3fc   :  { %1843 = vrcp.f32 %v710_v30 }
 0x3fd   :  { %1845 = vtanh.f32 %v687_v11 }
 0x3fe   :  { %1847 = vrcp.f32 %v708_v32 }
 0x3ff   :  { %1849 = vtanh.f32 %v688_v22 }
 0x403   :  { %v1838_v35 = vpop.eup %1837 }
 0x404   :  { %v1840_v36 = vpop.eup %1839  ;;  %v721_v37 = vsel %vm297_vm0, %v1836_v34, %v1838_v35 }
 0x405   :  { %v1842_v38 = vpop.eup %1841  ;;  %731 = vrot.lane.b32.xlu0 %v721_v37, %s2026_s13 }
 0x406   :  { %v1844_v39 = vpop.eup %1843 }
 0x407   :  { %v1846_v43 = vpop.eup %1845  ;;  %v722_v44 = vsel %vm297_vm0, %v1840_v36, %v1844_v39 }
 0x408   :  { %v1848_v7 = vpop.eup %1847  ;;  %733 = vrot.lane.b32.xlu1 %v722_v44, %s2026_s13  ;;  %v719_v12 = vsel %vm297_vm0, %v1846_v43, %v1842_v38 }
 0x409   :  { %727 = vrot.lane.b32.xlu0 %v719_v12, %s2026_s13  ;;  %v1850_v14 = vpop.eup %1849 }
 0x40a   :  { %v720_v46 = vsel %vm297_vm0, %v1850_v14, %v1848_v7 }
 0x40c   :  { %729 = vrot.lane.b32.xlu1 %v720_v46, %s2026_s13 }
 0x40d   :  { %743 = vrot.lane.b32.xlu0 %v719_v12, %s2027_s14 }
 0x410   :  { %745 = vrot.lane.b32.xlu1 %v720_v46, %s2027_s14 }
 0x411   :  { %747 = vrot.lane.b32.xlu0 %v721_v37, %s2027_s14 }
 0x414   :  { %749 = vrot.lane.b32.xlu1 %v722_v44, %s2027_s14 }
 0x415   :  { %767 = vrot.lane.b32.xlu0 %v719_v12, %s2028_s15 }
 0x418   :  { %769 = vrot.lane.b32.xlu1 %v720_v46, %s2028_s15 }
 0x419   :  { %771 = vrot.lane.b32.xlu0 %v721_v37, %s2028_s15 }
 0x41c   :  { %773 = vrot.lane.b32.xlu1 %v722_v44, %s2028_s15 }
 0x41d   :  { %116 = vperm.xlu0 %1759, %v37_v47  }
 0x420   :  { %121 = vperm.xlu1 %1760, %v38_v48  }
 0x421   :  { %126 = vperm.xlu0 %1759, %v39_v49  }
 0x424   :  { %131 = vperm.xlu1 %1760, %v40_v50  }
 0x477   :  { %v732_v51 = vpop.permute.xlu0 %731 }
 0x478   :  { %v741_v62 = vmul.f32 %v732_v51, %v721_v37 }
 0x47a   :  { %v734_v52 = vpop.permute.xlu1 %733 }
 0x47b   :  { %v728_v53 = vpop.permute.xlu0 %727  ;;  %v742_v5 = vmul.f32 %v734_v52, %v722_v44 }
 0x47c   :  { %v739_v56 = vmul.f32 %v728_v53, %v719_v12 }
 0x47e   :  { %v730_v54 = vpop.permute.xlu1 %729 }
 0x47f   :  { %v744_v55 = vpop.permute.xlu0 %743  ;;  %v740_v59 = vmul.f32 %v730_v54, %v720_v46 }
 0x480   :  { %v755_v18 = vmul.f32 %v744_v55, %v2215_v33 }
 0x482   :  { %v2277_v57 = vadd.f32 %v755_v18, %v739_v56  ;;  %v746_v58 = vpop.permute.xlu1 %745 }
 0x483   :  { %v756_v60 = vmul.f32 %v746_v58, %v2220_v40  ;;  %v748_v61 = vpop.permute.xlu0 %747 }
 0x484   :  { %v757_v63 = vmul.f32 %v748_v61, %v2222_v41  ;;  %1851 = vtanh.f32 %v2277_v57 }
 0x485   :  { %v2282_v2 = vadd.f32 %v756_v60, %v740_v59 }
 0x486   :  { %v2284_v3 = vadd.f32 %v757_v63, %v741_v62  ;;  %v750_v4 = vpop.permute.xlu1 %749 }
 0x487   :  { %1853 = vtanh.f32 %v2282_v2  ;;  %v758_v33 = vmul.f32 %v750_v4, %v2227_v45  ;;  %v768_v41 = vpop.permute.xlu0 %767 }
 0x488   :  { %1855 = vtanh.f32 %v2284_v3 }
 0x489   :  { %v2289_v6 = vadd.f32 %v758_v33, %v742_v5 }
 0x48a   :  { %v770_v8 = vpop.permute.xlu1 %769 }
 0x48b   :  { %1857 = vtanh.f32 %v2289_v6  ;;  %v772_v20 = vpop.permute.xlu0 %771 }
 0x48e   :  { %v1852_v40 = vpop.eup %1851  ;;  %v774_v21 = vpop.permute.xlu1 %773 }
 0x48f   :  { %v779_v11 = vmul.f32 %v1852_v40, %v768_v41  ;;  %v41_v41 = vld [vmem:[%s2562_s0 + $0x80] sm:$0xff] }
 0x491   :  { %v1854_v10 = vpop.eup %1853 }
 0x492   :  { %v780_v13 = vmul.f32 %v1854_v10, %v770_v8  ;;  %v1856_v16 = vpop.eup %1855  ;;  %v42_v8 = vld [vmem:[%s2562_s0 + $0x88] sm:$0xff]  ;;  %v43_v10 = vld [vmem:[%s2562_s0 + $0x90] sm:$0xff] }
 0x493   :  { %v781_v22 = vmul.f32 %v1856_v16, %v772_v20 }
 0x494   :  { %v788_v17 = vpack.c.bf16 %v780_v13, %v779_v11  ;;  %v44_v11 = vld [vmem:[%s2562_s0 + $0x98] sm:$0xff] }
 0x495   :  { %v1858_v19 = vpop.eup %1857 }
 0x496   :  { %v782_v23 = vmul.f32 %v1858_v19, %v774_v21  ;;  %1702 = vmatprep.mubr.msk.bf16.mxu1 %vm314_vm1, %v788_v17 }
 0x498   :  { %v789_v45 = vpack.c.bf16 %v782_v23, %v781_v22 }
 0x49a   :  { %1703 = vmatmul.mubr.msk.bf16.vlgmr.msra.gmra.mrb[4].mxu1 %vm314_vm1, %v789_v45 }
 0x49b   :  { %1715 = vmatpush3.bf16.msra.mxu1 %v2070_v0 }
 0x49c   :  { %1716 = vmatprep.subr.bf16.mxu1 %v2075_v1  ;;  %v117_v24 = vpop.permute.xlu0 %116 }
 0x49d   :  { %v212_v29 = vmul.f32 %v2106_v9, %v117_v24 }
 0x49f   :  { %1717 = vmatpush3.bf16.msra.mxu1 %v2075_v1  ;;  %v122_v25 = vpop.permute.xlu1 %121  ;;  %v247_v0 = vadd.f32 %v2114_v15, %v212_v29 }
 0x4a0   :  { %v127_v26 = vpop.permute.xlu0 %126  ;;  %v213_v31 = vmul.f32 %v2106_v9, %v122_v25 }
 0x4a1   :  { %v214_v28 = vmul.f32 %v2106_v9, %v127_v26 }
 0x4a2   :  { %v248_v39 = vadd.f32 %v2114_v15, %v213_v31 }
 0x4a3   :  { %v132_v27 = vpop.permute.xlu1 %131  ;;  %v249_v32 = vadd.f32 %v2114_v15, %v214_v28 }
 0x4a4   :  { %v215_v30 = vmul.f32 %v2106_v9, %v132_v27 }
 0x4a6   :  { %v250_v1 = vadd.f32 %v2114_v15, %v215_v30 }
 0x56d   :  { %v1704_v34 = vpop.f32.mrb[4].mxu1 }
 0x56e   :  { %v847_v35 = vadd.f32 %v1704_v34, %v249_v32  ;;  %v830_v36 = vpop.f32.mrb[5].mxu1 }
 0x56f   :  { %v845_v37 = vadd.f32 %v830_v36, %v247_v0  ;;  %v1705_v38 = vpop.f32.mrb[6].mxu1 }
 0x570   :  { %v1613_v43 = vmul.f32 -1.442695, %v847_v35  ;;  %v848_v44 = vadd.f32 %v1705_v38, %v250_v1  ;;  %v833_v7 = vpop.f32.mrb[7].mxu1 }
 0x571   :  { %v1611_v12 = vmul.f32 -1.442695, %v845_v37  ;;  %v846_v14 = vadd.f32 %v833_v7, %v248_v39 }
 0x572   :  { %1859 = vpow2.f32 %v1613_v43  ;;  %v1614_v46 = vmul.f32 -1.442695, %v848_v44 }
 0x573   :  { %1861 = vpow2.f32 %v1611_v12  ;;  %v1612_v47 = vmul.f32 -1.442695, %v846_v14 }
 0x574   :  { %1863 = vpow2.f32 %v1614_v46  ;;  %v1998_v46 = vld [vmem:[%s2563_s1 + $0x8] sm:$0xff]  }
 0x575   :  { %1865 = vpow2.f32 %v1612_v47 }
 0x576   :  { %1867 = vtanh.f32 %v847_v35 }
 0x57c   :  { %v1860_v48 = vpop.eup %1859 }
 0x57d   :  { %v1862_v49 = vpop.eup %1861  ;;  %v867_v50 = vadd.f32 1.0, %v1860_v48 }
 0x57e   :  { %v865_v51 = vadd.f32 1.0, %v1862_v49  ;;  %v1864_v52 = vpop.eup %1863 }
 0x57f   :  { %1869 = vrcp.f32 %v867_v50  ;;  %v868_v53 = vadd.f32 1.0, %v1864_v52  ;;  %v1866_v54 = vpop.eup %1865 }
 0x580   :  { %1871 = vtanh.f32 %v848_v44  ;;  %v866_v55 = vadd.f32 1.0, %v1866_v54  ;;  %v1868_v56 = vpop.eup %1867 }
 0x581   :  { %1873 = vrcp.f32 %v865_v51 }
 0x582   :  { %1875 = vrcp.f32 %v868_v53 }
 0x583   :  { %1877 = vtanh.f32 %v845_v37 }
 0x584   :  { %1879 = vrcp.f32 %v866_v55 }
 0x585   :  { %1881 = vtanh.f32 %v846_v14  ;;  %v1997_v14 = vld [vmem:[%s2563_s1] sm:$0xff]  }
 0x589   :  { %v1870_v18 = vpop.eup %1869 }
 0x58a   :  { %v1872_v58 = vpop.eup %1871  ;;  %v879_v59 = vsel %vm297_vm0, %v1868_v56, %v1870_v18 }
 0x58b   :  { %v1874_v60 = vpop.eup %1873  ;;  %889 = vrot.lane.b32.xlu0 %v879_v59, %s2026_s13 }
 0x58c   :  { %v1876_v61 = vpop.eup %1875 }
 0x58d   :  { %v1878_v62 = vpop.eup %1877  ;;  %v880_v63 = vsel %vm297_vm0, %v1872_v58, %v1876_v61 }
 0x58e   :  { %v1880_v4 = vpop.eup %1879  ;;  %891 = vrot.lane.b32.xlu1 %v880_v63, %s2026_s13  ;;  %v877_v5 = vsel %vm297_vm0, %v1878_v62, %v1874_v60 }
 0x58f   :  { %885 = vrot.lane.b32.xlu0 %v877_v5, %s2026_s13  ;;  %v1882_v33 = vpop.eup %1881 }
 0x590   :  { %v878_v40 = vsel %vm297_vm0, %v1882_v33, %v1880_v4 }
 0x592   :  { %887 = vrot.lane.b32.xlu1 %v878_v40, %s2026_s13 }
 0x593   :  { %901 = vrot.lane.b32.xlu0 %v877_v5, %s2027_s14 }
 0x596   :  { %903 = vrot.lane.b32.xlu1 %v878_v40, %s2027_s14 }
 0x597   :  { %905 = vrot.lane.b32.xlu0 %v879_v59, %s2027_s14 }
 0x59a   :  { %907 = vrot.lane.b32.xlu1 %v880_v63, %s2027_s14 }
 0x59b   :  { %925 = vrot.lane.b32.xlu0 %v877_v5, %s2028_s15 }
 0x59e   :  { %927 = vrot.lane.b32.xlu1 %v878_v40, %s2028_s15 }
 0x59f   :  { %929 = vrot.lane.b32.xlu0 %v879_v59, %s2028_s15 }
 0x5a2   :  { %931 = vrot.lane.b32.xlu1 %v880_v63, %s2028_s15 }
 0x5a3   :  { %136 = vperm.xlu0 %1759, %v41_v41  }
 0x5a6   :  { %141 = vperm.xlu1 %1760, %v42_v8  }
 0x5a7   :  { %146 = vperm.xlu0 %1759, %v43_v10  }
 0x5aa   :  { %151 = vperm.xlu1 %1760, %v44_v11  }
 0x5fd   :  { %v890_v13 = vpop.permute.xlu0 %889 }
 0x5fe   :  { %v899_v27 = vmul.f32 %v890_v13, %v879_v59 }
 0x600   :  { %v892_v16 = vpop.permute.xlu1 %891 }
 0x601   :  { %v886_v17 = vpop.permute.xlu0 %885  ;;  %v900_v32 = vmul.f32 %v892_v16, %v880_v63 }
 0x602   :  { %v897_v21 = vmul.f32 %v886_v17, %v877_v5 }
 0x604   :  { %v888_v19 = vpop.permute.xlu1 %887 }
 0x605   :  { %v902_v20 = vpop.permute.xlu0 %901  ;;  %v898_v24 = vmul.f32 %v888_v19, %v878_v40 }
 0x606   :  { %v913_v22 = vmul.f32 %v902_v20, %v2277_v57 }
 0x608   :  { %v2338_v23 = vadd.f32 %v913_v22, %v897_v21  ;;  %v904_v45 = vpop.permute.xlu1 %903 }
 0x609   :  { %v914_v25 = vmul.f32 %v904_v45, %v2282_v2  ;;  %v906_v26 = vpop.permute.xlu0 %905 }
 0x60a   :  { %v915_v28 = vmul.f32 %v906_v26, %v2284_v3  ;;  %1883 = vtanh.f32 %v2338_v23 }
 0x60b   :  { %v2343_v29 = vadd.f32 %v914_v25, %v898_v24 }
 0x60c   :  { %v2345_v30 = vadd.f32 %v915_v28, %v899_v27  ;;  %v908_v31 = vpop.permute.xlu1 %907 }
 0x60d   :  { %1885 = vtanh.f32 %v2343_v29  ;;  %v916_v57 = vmul.f32 %v908_v31, %v2289_v6  ;;  %v926_v3 = vpop.permute.xlu0 %925 }
 0x60e   :  { %1887 = vtanh.f32 %v2345_v30 }
 0x60f   :  { %v2350_v34 = vadd.f32 %v916_v57, %v900_v32 }
 0x610   :  { %v928_v0 = vpop.permute.xlu1 %927 }
 0x611   :  { %1889 = vtanh.f32 %v2350_v34  ;;  %v930_v43 = vpop.permute.xlu0 %929 }
 0x614   :  { %v1884_v2 = vpop.eup %1883  ;;  %v932_v44 = vpop.permute.xlu1 %931 }
 0x615   :  { %v937_v36 = vmul.f32 %v1884_v2, %v926_v3  ;;  %v45_v3 = vld [vmem:[%s2562_s0 + $0xa0] sm:$0xff] }
 0x617   :  { %v1886_v35 = vpop.eup %1885 }
 0x618   :  { %v938_v1 = vmul.f32 %v1886_v35, %v928_v0  ;;  %v1888_v37 = vpop.eup %1887  ;;  %v46_v0 = vld [vmem:[%s2562_s0 + $0xa8] sm:$0xff]  ;;  %v47_v35 = vld [vmem:[%s2562_s0 + $0xb0] sm:$0xff] }
 0x619   :  { %v939_v7 = vmul.f32 %v1888_v37, %v930_v43 }
 0x61a   :  { %v946_v38 = vpack.c.bf16 %v938_v1, %v937_v36  ;;  %v48_v36 = vld [vmem:[%s2562_s0 + $0xb8] sm:$0xff] }
 0x61b   :  { %v1890_v39 = vpop.eup %1889 }
 0x61c   :  { %v940_v12 = vmul.f32 %v1890_v39, %v932_v44  ;;  %1710 = vmatprep.mubr.msk.bf16.mxu0 %vm314_vm1, %v946_v38 }
 0x61e   :  { %v947_v6 = vpack.c.bf16 %v940_v12, %v939_v7 }
 0x620   :  { %1711 = vmatmul.mubr.msk.bf16.vlgmr.msra.gmra.mrb[8].mxu0 %vm314_vm1, %v947_v6 }
 0x621   :  { %1723 = vmatpush3.bf16.msra.mxu0 %v1997_v14 }
 0x622   :  { %1724 = vmatprep.subr.bf16.mxu0 %v1998_v46  ;;  %v137_v47 = vpop.permute.xlu0 %136 }
 0x623   :  { %v216_v52 = vmul.f32 %v2106_v9, %v137_v47 }
 0x625   :  { %1725 = vmatpush3.bf16.msra.mxu0 %v1998_v46  ;;  %v142_v48 = vpop.permute.xlu1 %141  ;;  %v251_v18 = vadd.f32 %v2114_v15, %v216_v52 }
 0x626   :  { %v147_v49 = vpop.permute.xlu0 %146  ;;  %v217_v54 = vmul.f32 %v2106_v9, %v142_v48 }
 0x627   :  { %v218_v51 = vmul.f32 %v2106_v9, %v147_v49 }
 0x628   :  { %v252_v63 = vadd.f32 %v2114_v15, %v217_v54 }
 0x629   :  { %v152_v50 = vpop.permute.xlu1 %151  ;;  %v253_v55 = vadd.f32 %v2114_v15, %v218_v51 }
 0x62a   :  { %v219_v53 = vmul.f32 %v2106_v9, %v152_v50 }
 0x62c   :  { %v254_v60 = vadd.f32 %v2114_v15, %v219_v53 }
 0x6f3   :  { %v1712_v56 = vpop.f32.mrb[8].mxu0 }
 0x6f4   :  { %v1005_v58 = vadd.f32 %v1712_v56, %v253_v55  ;;  %v988_v59 = vpop.f32.mrb[9].mxu0 }
 0x6f5   :  { %v1003_v61 = vadd.f32 %v988_v59, %v251_v18  ;;  %v1713_v62 = vpop.f32.mrb[10].mxu0 }
 0x6f6   :  { %v1619_v4 = vmul.f32 -1.442695, %v1005_v58  ;;  %v1006_v5 = vadd.f32 %v1713_v62, %v254_v60  ;;  %v991_v33 = vpop.f32.mrb[11].mxu0 }
 0x6f7   :  { %v1617_v40 = vmul.f32 -1.442695, %v1003_v61  ;;  %v1004_v41 = vadd.f32 %v991_v33, %v252_v63 }
 0x6f8   :  { %1891 = vpow2.f32 %v1619_v4  ;;  %v1620_v9 = vmul.f32 -1.442695, %v1006_v5 }
 0x6f9   :  { %1893 = vpow2.f32 %v1617_v40  ;;  %v1618_v8 = vmul.f32 -1.442695, %v1004_v41 }
 0x6fa   :  { %1895 = vpow2.f32 %v1620_v9 }
 0x6fb   :  { %1897 = vpow2.f32 %v1618_v8  ;;  %v2422_v8 = vld [vmem:[%s2564_s2] ss:$0 sm:$0xff] }
 0x6fc   :  { %1899 = vtanh.f32 %v1005_v58 }
 0x702   :  { %v1892_v10 = vpop.eup %1891 }
 0x703   :  { %v1894_v11 = vpop.eup %1893  ;;  %v1025_v13 = vadd.f32 1.0, %v1892_v10 }
 0x704   :  { %v1023_v16 = vadd.f32 1.0, %v1894_v11  ;;  %v1896_v17 = vpop.eup %1895 }
 0x705   :  { %1901 = vrcp.f32 %v1025_v13  ;;  %v1026_v15 = vadd.f32 1.0, %v1896_v17  ;;  %v1898_v19 = vpop.eup %1897  ;;  %v2431_v17 = vld [vmem:[%s2565_s3] ss:$0 sm:$0xff] }
 0x706   :  { %1903 = vtanh.f32 %v1006_v5  ;;  %v1024_v20 = vadd.f32 1.0, %v1898_v19  ;;  %v1900_v21 = vpop.eup %1899 }
 0x707   :  { %1905 = vrcp.f32 %v1023_v16 }
 0x708   :  { %1907 = vrcp.f32 %v1026_v15 }
 0x709   :  { %1909 = vtanh.f32 %v1003_v61 }
 0x70a   :  { %1911 = vrcp.f32 %v1024_v20 }
 0x70b   :  { %1913 = vtanh.f32 %v1004_v41 }
 0x70f   :  { %v1902_v22 = vpop.eup %1901 }
 0x710   :  { %v1904_v45 = vpop.eup %1903  ;;  %v1037_v24 = vsel %vm297_vm0, %v1900_v21, %v1902_v22 }
 0x711   :  { %v1906_v25 = vpop.eup %1905  ;;  %1047 = vrot.lane.b32.xlu0 %v1037_v24, %s2026_s13 }
 0x712   :  { %v1908_v26 = vpop.eup %1907 }
 0x713   :  { %v1910_v27 = vpop.eup %1909  ;;  %v1038_v28 = vsel %vm297_vm0, %v1904_v45, %v1908_v26 }
 0x714   :  { %v1912_v31 = vpop.eup %1911  ;;  %1049 = vrot.lane.b32.xlu1 %v1038_v28, %s2026_s13  ;;  %v1035_v32 = vsel %vm297_vm0, %v1910_v27, %v1906_v25 }
 0x715   :  { %1043 = vrot.lane.b32.xlu0 %v1035_v32, %s2026_s13  ;;  %v1914_v57 = vpop.eup %1913 }
 0x716   :  { %v1036_v2 = vsel %vm297_vm0, %v1914_v57, %v1912_v31 }
 0x718   :  { %1045 = vrot.lane.b32.xlu1 %v1036_v2, %s2026_s13 }
 0x719   :  { %1059 = vrot.lane.b32.xlu0 %v1035_v32, %s2027_s14 }
 0x71c   :  { %1061 = vrot.lane.b32.xlu1 %v1036_v2, %s2027_s14 }
 0x71d   :  { %1063 = vrot.lane.b32.xlu0 %v1037_v24, %s2027_s14 }
 0x720   :  { %1065 = vrot.lane.b32.xlu1 %v1038_v28, %s2027_s14 }
 0x721   :  { %1083 = vrot.lane.b32.xlu0 %v1035_v32, %s2028_s15 }
 0x724   :  { %1085 = vrot.lane.b32.xlu1 %v1036_v2, %s2028_s15 }
 0x725   :  { %1087 = vrot.lane.b32.xlu0 %v1037_v24, %s2028_s15 }
 0x728   :  { %1089 = vrot.lane.b32.xlu1 %v1038_v28, %s2028_s15 }
 0x729   :  { %156 = vperm.xlu0 %1759, %v45_v3  }
 0x72c   :  { %161 = vperm.xlu1 %1760, %v46_v0  }
 0x72d   :  { %166 = vperm.xlu0 %1759, %v47_v35  }
 0x730   :  { %171 = vperm.xlu1 %1760, %v48_v36  }
 0x783   :  { %v1048_v1 = vpop.permute.xlu0 %1047 }
 0x784   :  { %v1057_v48 = vmul.f32 %v1048_v1, %v1037_v24 }
 0x786   :  { %v1050_v37 = vpop.permute.xlu1 %1049 }
 0x787   :  { %v1044_v38 = vpop.permute.xlu0 %1043  ;;  %v1058_v53 = vmul.f32 %v1050_v37, %v1038_v28 }
 0x788   :  { %v1055_v44 = vmul.f32 %v1044_v38, %v1035_v32 }
 0x78a   :  { %v1046_v39 = vpop.permute.xlu1 %1045 }
 0x78b   :  { %v1060_v43 = vpop.permute.xlu0 %1059  ;;  %v1056_v14 = vmul.f32 %v1046_v39, %v1036_v2 }
 0x78c   :  { %v1071_v7 = vmul.f32 %v1060_v43, %v2338_v23 }
 0x78e   :  { %v2402_v12 = vadd.f32 %v1071_v7, %v1055_v44  ;;  %v1062_v6 = vpop.permute.xlu1 %1061 }
 0x78f   :  { %v1072_v46 = vmul.f32 %v1062_v6, %v2343_v29  ;;  %v1064_v47 = vpop.permute.xlu0 %1063 }
 0x790   :  { %v1073_v49 = vmul.f32 %v1064_v47, %v2345_v30  ;;  %1915 = vtanh.f32 %v2402_v12 }
 0x791   :  { %v2407_v50 = vadd.f32 %v1072_v46, %v1056_v14 }
 0x792   :  { %v2409_v51 = vadd.f32 %v1073_v49, %v1057_v48  ;;  %v1066_v52 = vpop.permute.xlu1 %1065 }
 0x793   :  { %1917 = vtanh.f32 %v2407_v50  ;;  %v1074_v23 = vmul.f32 %v1066_v52, %v2350_v34  ;;  %v1084_v30 = vpop.permute.xlu0 %1083 }
 0x794   :  { %1919 = vtanh.f32 %v2409_v51 }
 0x795   :  { %v2414_v54 = vadd.f32 %v1074_v23, %v1058_v53 }
 0x796   :  { %v1086_v55 = vpop.permute.xlu1 %1085 }
 0x797   :  { %1921 = vtanh.f32 %v2414_v54  ;;  %v1088_v62 = vpop.permute.xlu0 %1087 }
 0x79a   :  { %v1916_v29 = vpop.eup %1915  ;;  %v1090_v63 = vpop.permute.xlu1 %1089 }
 0x79b   :  { %v1095_v18 = vmul.f32 %v1916_v29, %v1084_v30  ;;  %v49_v30 = vld [vmem:[%s2562_s0 + $0xc0] sm:$0xff] }
 0x79d   :  { %v1918_v56 = vpop.eup %1917 }
 0x79e   :  { %v1096_v58 = vmul.f32 %v1918_v56, %v1086_v55  ;;  %v1920_v59 = vpop.eup %1919  ;;  %v50_v55 = vld [vmem:[%s2562_s0 + $0xc8] sm:$0xff]  ;;  %v51_v56 = vld [vmem:[%s2562_s0 + $0xd0] sm:$0xff] }
 0x79f   :  { %v1097_v4 = vmul.f32 %v1920_v59, %v1088_v62 }
 0x7a0   :  { %v1104_v60 = vpack.c.bf16 %v1096_v58, %v1095_v18  ;;  %v52_v18 = vld [vmem:[%s2562_s0 + $0xd8] sm:$0xff] }
 0x7a1   :  { %v1922_v61 = vpop.eup %1921 }
 0x7a2   :  { %v1098_v5 = vmul.f32 %v1922_v61, %v1090_v63  ;;  %1718 = vmatprep.mubr.msk.bf16.mxu1 %vm314_vm1, %v1104_v60 }
 0x7a4   :  { %v1105_v34 = vpack.c.bf16 %v1098_v5, %v1097_v4 }
 0x7a6   :  { %1719 = vmatmul.mubr.msk.bf16.vlgmr.msra.gmra.mrb[8].mxu1 %vm314_vm1, %v1105_v34 }
 0x7a8   :  { %v157_v33 = vpop.permute.xlu0 %156 }
 0x7a9   :  { %v220_v11 = vmul.f32 %v2422_v8, %v157_v33 }
 0x7ab   :  { %v162_v40 = vpop.permute.xlu1 %161  ;;  %v255_v20 = vadd.f32 %v2431_v17, %v220_v11 }
 0x7ac   :  { %v167_v41 = vpop.permute.xlu0 %166  ;;  %v221_v16 = vmul.f32 %v2422_v8, %v162_v40 }
 0x7ad   :  { %v222_v10 = vmul.f32 %v2422_v8, %v167_v41 }
 0x7ae   :  { %v256_v26 = vadd.f32 %v2431_v17, %v221_v16 }
 0x7af   :  { %v172_v9 = vpop.permute.xlu1 %171  ;;  %v257_v15 = vadd.f32 %v2431_v17, %v222_v10 }
 0x7b0   :  { %v223_v13 = vmul.f32 %v2422_v8, %v172_v9 }
 0x7b2   :  { %v258_v45 = vadd.f32 %v2431_v17, %v223_v13 }
 0x879   :  { %v1720_v19 = vpop.f32.mrb[8].mxu1 }
 0x87a   :  { %v1163_v21 = vadd.f32 %v1720_v19, %v257_v15  ;;  %v1146_v22 = vpop.f32.mrb[9].mxu1 }
 0x87b   :  { %v1161_v24 = vadd.f32 %v1146_v22, %v255_v20  ;;  %v1721_v25 = vpop.f32.mrb[10].mxu1 }
 0x87c   :  { %v1625_v27 = vmul.f32 -1.442695, %v1163_v21  ;;  %v1164_v28 = vadd.f32 %v1721_v25, %v258_v45  ;;  %v1149_v31 = vpop.f32.mrb[11].mxu1 }
 0x87d   :  { %v1623_v32 = vmul.f32 -1.442695, %v1161_v24  ;;  %v1162_v57 = vadd.f32 %v1149_v31, %v256_v26 }
 0x87e   :  { %1923 = vpow2.f32 %v1625_v27  ;;  %v1626_v2 = vmul.f32 -1.442695, %v1164_v28 }
 0x87f   :  { %1925 = vpow2.f32 %v1623_v32  ;;  %v1624_v3 = vmul.f32 -1.442695, %v1162_v57 }
 0x880   :  { %1927 = vpow2.f32 %v1626_v2 }
 0x881   :  { %1929 = vpow2.f32 %v1624_v3 }
 0x882   :  { %1931 = vtanh.f32 %v1163_v21 }
 0x888   :  { %v1924_v0 = vpop.eup %1923 }
 0x889   :  { %v1926_v35 = vpop.eup %1925  ;;  %v1183_v36 = vadd.f32 1.0, %v1924_v0 }
 0x88a   :  { %v1181_v1 = vadd.f32 1.0, %v1926_v35  ;;  %v1928_v37 = vpop.eup %1927 }
 0x88b   :  { %1933 = vrcp.f32 %v1183_v36  ;;  %v1184_v38 = vadd.f32 1.0, %v1928_v37  ;;  %v1930_v39 = vpop.eup %1929 }
 0x88c   :  { %1935 = vtanh.f32 %v1164_v28  ;;  %v1182_v43 = vadd.f32 1.0, %v1930_v39  ;;  %v1932_v44 = vpop.eup %1931 }
 0x88d   :  { %1937 = vrcp.f32 %v1181_v1 }
 0x88e   :  { %1939 = vrcp.f32 %v1184_v38 }
 0x88f   :  { %1941 = vtanh.f32 %v1161_v24 }
 0x890   :  { %1943 = vrcp.f32 %v1182_v43 }
 0x891   :  { %1945 = vtanh.f32 %v1162_v57 }
 0x895   :  { %v1934_v7 = vpop.eup %1933 }
 0x896   :  { %v1936_v6 = vpop.eup %1935  ;;  %v1195_v14 = vsel %vm297_vm0, %v1932_v44, %v1934_v7 }
 0x897   :  { %v1938_v46 = vpop.eup %1937  ;;  %1205 = vrot.lane.b32.xlu0 %v1195_v14, %s2026_s13 }
 0x898   :  { %v1940_v47 = vpop.eup %1939 }
 0x899   :  { %v1942_v48 = vpop.eup %1941  ;;  %v1196_v49 = vsel %vm297_vm0, %v1936_v6, %v1940_v47 }
 0x89a   :  { %v1944_v52 = vpop.eup %1943  ;;  %1207 = vrot.lane.b32.xlu1 %v1196_v49, %s2026_s13  ;;  %v1193_v53 = vsel %vm297_vm0, %v1942_v48, %v1938_v46 }
 0x89b   :  { %1201 = vrot.lane.b32.xlu0 %v1193_v53, %s2026_s13  ;;  %v1946_v23 = vpop.eup %1945 }
 0x89c   :  { %v1194_v29 = vsel %vm297_vm0, %v1946_v23, %v1944_v52 }
 0x89e   :  { %1203 = vrot.lane.b32.xlu1 %v1194_v29, %s2026_s13 }
 0x89f   :  { %1217 = vrot.lane.b32.xlu0 %v1193_v53, %s2027_s14 }
 0x8a2   :  { %1219 = vrot.lane.b32.xlu1 %v1194_v29, %s2027_s14 }
 0x8a3   :  { %1221 = vrot.lane.b32.xlu0 %v1195_v14, %s2027_s14 }
 0x8a6   :  { %1223 = vrot.lane.b32.xlu1 %v1196_v49, %s2027_s14 }
 0x8a7   :  { %1241 = vrot.lane.b32.xlu0 %v1193_v53, %s2028_s15 }
 0x8aa   :  { %1243 = vrot.lane.b32.xlu1 %v1194_v29, %s2028_s15 }
 0x8ab   :  { %1245 = vrot.lane.b32.xlu0 %v1195_v14, %s2028_s15 }
 0x8ae   :  { %1247 = vrot.lane.b32.xlu1 %v1196_v49, %s2028_s15 }
 0x8af   :  { %176 = vperm.xlu0 %1759, %v49_v30  }
 0x8b2   :  { %181 = vperm.xlu1 %1760, %v50_v55  }
 0x8b3   :  { %186 = vperm.xlu0 %1759, %v51_v56  }
 0x8b6   :  { %191 = vperm.xlu1 %1760, %v52_v18  }
 0x909   :  { %v1206_v58 = vpop.permute.xlu0 %1205 }
 0x90a   :  { %v1215_v9 = vmul.f32 %v1206_v58, %v1195_v14 }
 0x90c   :  { %v1208_v59 = vpop.permute.xlu1 %1207 }
 0x90d   :  { %v1202_v60 = vpop.permute.xlu0 %1201  ;;  %v1216_v15 = vmul.f32 %v1208_v59, %v1196_v49 }
 0x90e   :  { %v1213_v63 = vmul.f32 %v1202_v60, %v1193_v53 }
 0x910   :  { %v1204_v61 = vpop.permute.xlu1 %1203 }
 0x911   :  { %v1218_v62 = vpop.permute.xlu0 %1217  ;;  %v1214_v33 = vmul.f32 %v1204_v61, %v1194_v29 }
 0x912   :  { %v1229_v4 = vmul.f32 %v1218_v62, %v2402_v12 }
 0x914   :  { %v2470_v5 = vadd.f32 %v1229_v4, %v1213_v63  ;;  %v1220_v34 = vpop.permute.xlu1 %1219 }
 0x915   :  { %v1230_v40 = vmul.f32 %v1220_v34, %v2407_v50  ;;  %v1222_v41 = vpop.permute.xlu0 %1221 }
 0x916   :  { %v1231_v10 = vmul.f32 %v1222_v41, %v2409_v51  ;;  %1947 = vtanh.f32 %v2470_v5  ;;  %v1415_v41 = vld [vmem:[%s2566_s4] sm:$0xff] }
 0x917   :  { %v2475_v11 = vadd.f32 %v1230_v40, %v1214_v33 }
 0x918   :  { %v2477_v13 = vadd.f32 %v1231_v10, %v1215_v9  ;;  %v1224_v16 = vpop.permute.xlu1 %1223  ;;  %v1416_v9 = vld [vmem:[%s2566_s4 + $0x8] sm:$0xff] }
 0x919   :  { %1949 = vtanh.f32 %v2475_v11  ;;  %v1232_v12 = vmul.f32 %v1224_v16, %v2414_v54  ;;  %v1242_v51 = vpop.permute.xlu0 %1241  ;;  %v1744_v10 = vpack.c.bf16 %v1416_v9, %v1415_v41 }
 0x91a   :  { %1951 = vtanh.f32 %v2477_v13 }
 0x91b   :  { %v2482_v19 = vadd.f32 %v1232_v12, %v1216_v15  ;;  %1745 = vmatprep.subr.bf16.mxu1 %v1744_v10 }
 0x91c   :  { %v1244_v20 = vpop.permute.xlu1 %1243  ;;  %1747 = vmatpush3.bf16.msra.mxu1 %v1744_v10 }
 0x91d   :  { %1953 = vtanh.f32 %v2482_v19  ;;  %v1246_v27 = vpop.permute.xlu0 %1245 }
 0x920   :  { %v1948_v50 = vpop.eup %1947  ;;  %v1248_v28 = vpop.permute.xlu1 %1247 }
 0x921   :  { %v1253_v22 = vmul.f32 %v1948_v50, %v1242_v51  ;;  %v1417_v50 = vld [vmem:[%s2566_s4 + $0x10] sm:$0xff]  ;;  %v1418_v51 = vld [vmem:[%s2566_s4 + $0x18] sm:$0xff] }
 0x923   :  { %v1950_v21 = vpop.eup %1949 }
 0x924   :  { %v1254_v45 = vmul.f32 %v1950_v21, %v1244_v20  ;;  %v1952_v24 = vpop.eup %1951  ;;  %v1748_v20 = vpack.c.bf16 %v1418_v51, %v1417_v50 }
 0x925   :  { %v1255_v31 = vmul.f32 %v1952_v24, %v1246_v27 }
 0x926   :  { %v1262_v25 = vpack.c.bf16 %v1254_v45, %v1253_v22  ;;  %1749 = vmatprep.subr.bf16.mxu1 %v1748_v20 }
 0x927   :  { %v1954_v26 = vpop.eup %1953  ;;  %1751 = vmatpush3.bf16.msra.mxu1 %v1748_v20 }
 0x928   :  { %v1256_v32 = vmul.f32 %v1954_v26, %v1248_v28  ;;  %1726 = vmatprep.mubr.msk.bf16.mxu0 %vm314_vm1, %v1262_v25 }
 0x92a   :  { %v1263_v54 = vpack.c.bf16 %v1256_v32, %v1255_v31 }
 0x92c   :  { %1727 = vmatmul.mubr.msk.bf16.vlgmr.msra.gmra.mrb[12].mxu0 %vm314_vm1, %v1263_v54 }
 0x92e   :  { %v177_v57 = vpop.permute.xlu0 %176 }
 0x92f   :  { %v224_v36 = vmul.f32 %v2422_v8, %v177_v57 }
 0x931   :  { %v182_v2 = vpop.permute.xlu1 %181  ;;  %v259_v43 = vadd.f32 %v2431_v17, %v224_v36 }
 0x932   :  { %v187_v3 = vpop.permute.xlu0 %186  ;;  %v225_v37 = vmul.f32 %v2422_v8, %v182_v2 }
 0x933   :  { %v226_v35 = vmul.f32 %v2422_v8, %v187_v3 }
 0x934   :  { %v260_v47 = vadd.f32 %v2431_v17, %v225_v37 }
 0x935   :  { %v192_v0 = vpop.permute.xlu1 %191  ;;  %v261_v38 = vadd.f32 %v2431_v17, %v226_v35 }
 0x936   :  { %v227_v1 = vmul.f32 %v2422_v8, %v192_v0 }
 0x938   :  { %v262_v6 = vadd.f32 %v2431_v17, %v227_v1 }
 0x9ff   :  { %v1728_v39 = vpop.f32.mrb[12].mxu0 }
 0xa00   :  { %v1321_v44 = vadd.f32 %v1728_v39, %v261_v38  ;;  %v1304_v7 = vpop.f32.mrb[13].mxu0 }
 0xa01   :  { %v1319_v14 = vadd.f32 %v1304_v7, %v259_v43  ;;  %v1729_v46 = vpop.f32.mrb[14].mxu0 }
 0xa02   :  { %v1631_v48 = vmul.f32 -1.442695, %v1321_v44  ;;  %v1322_v49 = vadd.f32 %v1729_v46, %v262_v6  ;;  %v1307_v52 = vpop.f32.mrb[15].mxu0 }
 0xa03   :  { %v1629_v53 = vmul.f32 -1.442695, %v1319_v14  ;;  %v1320_v23 = vadd.f32 %v1307_v52, %v260_v47 }
 0xa04   :  { %1955 = vpow2.f32 %v1631_v48  ;;  %v1632_v29 = vmul.f32 -1.442695, %v1322_v49 }
 0xa05   :  { %1957 = vpow2.f32 %v1629_v53  ;;  %v1630_v8 = vmul.f32 -1.442695, %v1320_v23 }
 0xa07   :  { %1959 = vpow2.f32 %v1630_v8 }
 0xa08   :  { %1961 = vpow2.f32 %v1632_v29 }
 0xa09   :  { %1963 = vtanh.f32 %v1321_v44 }
 0xa0e   :  { %v1956_v30 = vpop.eup %1955 }
 0xa0f   :  { %v1958_v55 = vpop.eup %1957  ;;  %v1341_v56 = vadd.f32 1.0, %v1956_v30 }
 0xa10   :  { %v1339_v18 = vadd.f32 1.0, %v1958_v55 }
 0xa11   :  { %1965 = vrcp.f32 %v1341_v56  ;;  %v1960_v58 = vpop.eup %1959 }
 0xa12   :  { %1967 = vrcp.f32 %v1339_v18  ;;  %v1962_v17 = vpop.eup %1961  ;;  %v1340_v59 = vadd.f32 1.0, %v1960_v58 }
 0xa13   :  { %1969 = vtanh.f32 %v1319_v14  ;;  %v1342_v60 = vadd.f32 1.0, %v1962_v17  ;;  %v1964_v61 = vpop.eup %1963 }
 0xa14   :  { %1971 = vrcp.f32 %v1340_v59 }
 0xa15   :  { %1973 = vtanh.f32 %v1320_v23 }
 0xa16   :  { %1975 = vrcp.f32 %v1342_v60 }
 0xa17   :  { %1977 = vtanh.f32 %v1322_v49  ;;  %v1633_v49 = vld [vmem:[%s2567_s5] ss:$0 sm:$0xff]  ;;  %s2029_s5 = smov [#allocation3]  }
 0xa1b   :  { %v1966_v62 = vpop.eup %1965 }
 0xa1c   :  { %v1353_v63 = vsel %vm297_vm0, %v1964_v61, %v1966_v62  ;;  %v1968_v4 = vpop.eup %1967 }
 0xa1d   :  { %1379 = vrot.lane.b32.xlu1 %v1353_v63, %s2027_s14  ;;  %1363 = vrot.lane.b32.xlu0 %v1353_v63, %s2026_s13  ;;  %v1970_v34 = vpop.eup %1969 }
 0xa1e   :  { %v1351_v33 = vsel %vm297_vm0, %v1970_v34, %v1968_v4  ;;  %v1972_v40 = vpop.eup %1971 }
 0xa1f   :  { %v1974_v16 = vpop.eup %1973 }
 0xa20   :  { %v1352_v15 = vsel %vm297_vm0, %v1974_v16, %v1972_v40  ;;  %v1976_v12 = vpop.eup %1975 }
 0xa21   :  { %1375 = vrot.lane.b32.xlu1 %v1351_v33, %s2027_s14  ;;  %1359 = vrot.lane.b32.xlu0 %v1351_v33, %s2026_s13  ;;  %v1978_v21 = vpop.eup %1977 }
 0xa22   :  { %v1354_v22 = vsel %vm297_vm0, %v1978_v21, %v1976_v12 }
 0xa25   :  { %1377 = vrot.lane.b32.xlu1 %v1352_v15, %s2027_s14  ;;  %1361 = vrot.lane.b32.xlu0 %v1352_v15, %s2026_s13 }
 0xa29   :  { %1381 = vrot.lane.b32.xlu1 %v1354_v22, %s2027_s14  ;;  %1365 = vrot.lane.b32.xlu0 %v1354_v22, %s2026_s13  ;;  %s1578_s14 = sshll.u32 %s2029_s5, 4  ;;  %s1579_s14 = int_to_ptr.vmem [resolvable:$true] %s1578_s14 }
 0xa2a   :  { %p2006_p1 = scmp.lt.s32.totalorder %s1579_s14, %s1579_s14 }
 0xa2d   :  { %1401 = vrot.lane.b32.xlu1 %v1352_v15, %s2028_s15  ;;  %1399 = vrot.lane.b32.xlu0 %v1351_v33, %s2028_s15 }
 0xa31   :  { %1405 = vrot.lane.b32.xlu1 %v1354_v22, %s2028_s15  ;;  %1403 = vrot.lane.b32.xlu0 %v1353_v63, %s2028_s15  ;;  %s2001_s15 = scalar_lea.vmem %s1579_s14, 512 }
 0xa32   :  { %p2002_p0 = scmp.ne.s32.totalorder %s1579_s14, %s2001_s15  ;;  %p2007_p2 = scmp.lt.s32.totalorder %s2001_s15, %s2001_s15 }
 0xa34   :  { %p2008_p3 = por %p2007_p2, %p2006_p1 }
 0xa36   :  { %p2009_p4 = pnand %p2008_p3, %p2002_p0 }
 0xa8f   :  { %v1380_v45 = vpop.permute.xlu1 %1379  ;;  %v1364_v24 = vpop.permute.xlu0 %1363 }
 0xa90   :  { %v1389_v28 = vmul.f32 %v1380_v45, %v2477_v13  ;;  %v1373_v31 = vmul.f32 %v1364_v24, %v1353_v63 }
 0xa92   :  { %v1393_v0 = vadd.f32 %v1389_v28, %v1373_v31 }
 0xa93   :  { %v1376_v25 = vpop.permute.xlu1 %1375  ;;  %v1360_v26 = vpop.permute.xlu0 %1359 }
 0xa94   :  { %v1387_v42 = vmul.f32 %v1376_v25, %v2470_v5  ;;  %v1371_v27 = vmul.f32 %v1360_v26, %v1351_v33 }
 0xa96   :  { %v1391_v32 = vadd.f32 %v1387_v42, %v1371_v27 }
 0xa97   :  { %v1378_v54 = vpop.permute.xlu1 %1377  ;;  %v1362_v57 = vpop.permute.xlu0 %1361 }
 0xa98   :  { %1979 = vtanh.f32 %v1391_v32  ;;  %v1388_v2 = vmul.f32 %v1378_v54, %v2475_v11  ;;  %v1372_v3 = vmul.f32 %v1362_v57, %v1352_v15 }
 0xa9a   :  { %v1392_v35 = vadd.f32 %v1388_v2, %v1372_v3 }
 0xa9b   :  { %v1382_v36 = vpop.permute.xlu1 %1381  ;;  %v1366_v1 = vpop.permute.xlu0 %1365 }
 0xa9c   :  { %1981 = vtanh.f32 %v1392_v35  ;;  %v1390_v37 = vmul.f32 %v1382_v36, %v2482_v19  ;;  %v1374_v38 = vmul.f32 %v1366_v1, %v1354_v22 }
 0xa9d   :  { %1983 = vtanh.f32 %v1393_v0 }
 0xa9e   :  { %v1394_v5 = vadd.f32 %v1390_v37, %v1374_v38 }
 0xa9f   :  { %v1400_v39 = vpop.permute.xlu0 %1399  ;;  %v1402_v44 = vpop.permute.xlu1 %1401 }
 0xaa0   :  { %1985 = vtanh.f32 %v1394_v5 }
 0xaa2   :  { %v1980_v13 = vpop.eup %1979 }
 0xaa3   :  { %v1411_v43 = vmul.f32 %v1980_v13, %v1400_v39  ;;  %v1404_v7 = vpop.permute.xlu0 %1403  ;;  %v1406_v48 = vpop.permute.xlu1 %1405 }
 0xaa5   :  { %1738 = vmatprep.mubr.msk.f32.mxu1 %vm314_vm1, %v1411_v43 }
 0xaa6   :  { %v1982_v11 = vpop.eup %1981 }
 0xaa7   :  { %v1984_v6 = vpop.eup %1983  ;;  %v1412_v14 = vmul.f32 %v1982_v11, %v1402_v44 }
 0xaa8   :  { %v1413_v46 = vmul.f32 %v1984_v6, %v1404_v7 }
 0xaa9   :  { %1739 = vmatmul.mubr.msk.f32.vlgmr.msra.gmra.mrb[12].mxu1 %vm314_vm1, %v1412_v14 }
 0xaaa   :  { %v1986_v47 = vpop.eup %1985  ;;  %1741 = vmatprep.mubr.msk.f32.mxu1 %vm314_vm1, %v1413_v46 }
 0xaab   :  { %v1414_v19 = vmul.f32 %v1986_v47, %v1406_v48 }
 0xaad   :  { %1742 = vmatmul.mubr.msk.f32.gmra.mrb[14].mxu1 %vm314_vm1, %v1414_v19 }
 0xb7c   :  { %v1740_v52 = vpop.f32.mrb[12].mxu1 }
 0xb7d   :  { %v1510_v53 = vadd.f32 %v1740_v52, %v1633_v49  ;;  %v1504_v23 = vpop.f32.mrb[13].mxu1 }
 0xb7e   :  { %v1505_v8 = vadd.f32 %v1633_v49, %v1504_v23 }
 0xb7f   :  { %v1524_v29 = vsel %vm314_vm1, %v1510_v53, -inf }
 0xb80   :  { %v1523_v30 = vsel %vm314_vm1, %v1505_v8, -inf  ;;  %v1743_v55 = vpop.f32.mrb[14].mxu1 }
 0xb81   :  { %v1527_v56 = vmax.f32 %v1523_v30, %v1524_v29  ;;  %v1520_v18 = vadd.f32 %v1743_v55, %v1633_v49  ;;  %v1514_v58 = vpop.f32.mrb[15].mxu1 }
 0xb82   :  { %v1515_v17 = vadd.f32 %v1633_v49, %v1514_v58 }
 0xb83   :  { %v1526_v59 = vsel %vm314_vm1, %v1520_v18, -inf }
 0xb84   :  { %v1525_v60 = vsel %vm314_vm1, %v1515_v17, -inf }
 0xb85   :  { %v1528_v61 = vmax.f32 %v1525_v60, %v1526_v59 }
 0xb87   :  { %v1529_v62 = vmax.f32 %v1527_v56, %v1528_v61 }
 0xb89   :  { %v1530_v63 = vrot.slane %v1529_v62, 4 }
 0xb8b   :  { %v1531_v4 = vmax.f32 %v1529_v62, %v1530_v63 }
 0xb8d   :  { %v1532_v34 = vrot.slane %v1531_v4, 2 }
 0xb8f   :  { %v1533_v33 = vmax.f32 %v1531_v4, %v1532_v34 }
 0xb91   :  { %v1534_v40 = vrot.slane %v1533_v33, 1 }
 0xb93   :  { %v1535_v41 = vmax.f32 %v1533_v33, %v1534_v40 }
 0xb95   :  { %v1536_v9 = vsub.f32 %v1505_v8, %v1535_v41  ;;  %v1537_v10 = vsub.f32 %v1510_v53, %v1535_v41  ;;  %v1538_v16 = vsub.f32 %v1515_v17, %v1535_v41  ;;  %v1539_v15 = vsub.f32 %v1520_v18, %v1535_v41 }
 0xb97   :  { %v1540_v12 = vmul.f32 1.442695, %v1536_v9  ;;  %v1542_v50 = vmul.f32 1.442695, %v1537_v10  ;;  %v1544_v51 = vmul.f32 1.442695, %v1538_v16 }
 0xb98   :  { %v1546_v20 = vmul.f32 1.442695, %v1539_v15 }
 0xb99   :  { %1987 = vpow2.f32 %v1540_v12 }
 0xb9a   :  { %1989 = vpow2.f32 %v1542_v50 }
 0xb9b   :  { %1991 = vpow2.f32 %v1544_v51 }
 0xb9c   :  { %1993 = vpow2.f32 %v1546_v20 }
 0xba3   :  { %v1988_v21 = vpop.eup %1987 }
 0xba4   :  { %v1990_v22 = vpop.eup %1989  ;;  %v1548_v45 = vsel %vm314_vm1, %v1988_v21, 0.0 }
 0xba5   :  { %v1992_v24 = vpop.eup %1991  ;;  %v1549_v25 = vsel %vm314_vm1, %v1990_v22, 0.0 }
 0xba6   :  { %v1994_v26 = vpop.eup %1993  ;;  %v1550_v42 = vadd.f32 %v1549_v25, %v1548_v45  ;;  %v1551_v27 = vsel %vm314_vm1, %v1992_v24, 0.0 }
 0xba7   :  { %v1553_v31 = vsel %vm314_vm1, %v1994_v26, 0.0 }
 0xba8   :  { %v1552_v28 = vadd.f32 %v1551_v27, %v1550_v42 }
 0xbaa   :  { %v1554_v32 = vadd.f32 %v1553_v31, %v1552_v28 }
 0xbac   :  { %v1555_v54 = vrot.slane %v1554_v32, 4 }
 0xbae   :  { %v1556_v57 = vadd.f32 %v1555_v54, %v1554_v32 }
 0xbb0   :  { %v1557_v2 = vrot.slane %v1556_v57, 2 }
 0xbb2   :  { %v1558_v3 = vadd.f32 %v1557_v2, %v1556_v57 }
 0xbb4   :  { %v1559_v0 = vrot.slane %v1558_v3, 1 }
 0xbb6   :  { %v1560_v35 = vadd.f32 %v1559_v0, %v1558_v3 }
 0xbb8   :  { %1995 = vrcp.f32 %v1560_v35 }
 0xbc2   :  { %v1996_v36 = vpop.eup %1995 }
 0xbc3   :  { %v1562_v1 = vmul.f32 %v1996_v36, %v1560_v35 }
 0xbc5   :  { %v1563_v37 = vsub.f32 2.0, %v1562_v1 }
 0xbc7   :  { %v1564_v38 = vmul.f32 %v1996_v36, %v1563_v37 }
 0xbc9   :  { %v1567_v5 = vmul.f32 %v1992_v24, %v1564_v38  ;;  %v1565_v39 = vmul.f32 %v1988_v21, %v1564_v38  ;;  %v1566_v13 = vmul.f32 %v1990_v22, %v1564_v38  ;;  %v1568_v43 = vmul.f32 %v1994_v26, %v1564_v38 }
 0xbcb   :  { %1571 = vst.msk [vmem:[#allocation3 + $0x10] sm:$0xff] %vm314_vm1, %v1567_v5  ;;  %1569 = vst.msk [vmem:[#allocation3] sm:$0xff] %vm314_vm1, %v1565_v39 }
 0xbcc   :  { %1570 = vst.msk [vmem:[#allocation3 + $0x8] sm:$0xff] %vm314_vm1, %v1566_v13  ;;  %1572 = vst.msk [vmem:[#allocation3 + $0x18] sm:$0xff] %vm314_vm1, %v1568_v43 }
 0xbcd   :  { %2012 = shalt.err (!%p2009_p4)
}
 0xbce   :  { %s2013_s11 = scalar_lea.hbm %s2568_s6, 512 }
 0xbcf   :  { %p2014_p5 = scmp.ne.s32.totalorder %s2568_s6, %s2013_s11  ;;  %p2017_p6 = scmp.lt.u32.totalorder %s2013_s11, %s2568_s6 }
 0xbd1   :  { %p2019_p7 = pnand %p2017_p6, %p2014_p5 }
 0xbd3   :  { %2022 = shalt.err (!%p2019_p7)
}
 0xbd4   :  { %s2030_s19 = smov 128   ;;  %s2031_s20 = smov 8  }
 0xbd5   :  { %1584 = dma.vmem_to_hbm [thread:$0]  %s1579_s14, 512, %s2568_s6, [#allocation4], %s2030_s19, %s2030_s19, %s2031_s20  }
 0xbd6   :  { %2023 = dma.done.wait [#allocation4], 512  }
 0xbd7   :  { %2024 = vsyncadd [#allocation4], 4294966784 }
 0xbd8   :  { %1588 = vsyncpa [#allocation4], 1 }

</bundles_post_ra>
